<compile_context>
chip_gen: v7x
topology: tpu7x:2x2x1
jax: 0.10.0
libtpu: 0.0.40
codegen_flags: <defaults>
</compile_context>

<pallas_src>
import functools

import jax
import jax.numpy as jnp
from jax import lax
from jax.experimental import pallas as pl
from jax.experimental.pallas import tpu as pltpu

EPS = 1e-5


# ----------------------------------- config helpers --------------------------------------
def _vmem_limit_bytes():
    """~3/4 of physical VMEM, capped at 96 MiB (→ ~96 MiB v5e/v6e, ~48 MiB v7x)."""
    cap = 128 * 1024 * 1024
    try:
        cap = int(pltpu.get_tpu_info().vmem_capacity_bytes)
    except Exception:
        pass
    return int(min(cap * 3 // 4, 96 * 1024 * 1024))


def _compiler_params():
    return pltpu.CompilerParams(
        dimension_semantics=("parallel",),        # shard batch blocks across TensorCores
        vmem_limit_bytes=_vmem_limit_bytes(),
    )


def _images_per_block(N, C, HW, target_bytes=1 << 20):
    """Images per grid step: large enough per-step blocks to amortize pipeline overhead."""
    per_img = C * HW * 4
    nb = int(max(1, min(N, target_bytes // per_img)))
    while N % nb:                                  # keep index maps simple
        nb -= 1
    return nb


def _make_tap_masks(H, W):
    """(9, H*W) f32 zero-halo masks for the 3x3 taps (hoisted out of the kernels)."""
    pos = jnp.arange(H * W, dtype=jnp.int32)
    row, col = pos // W, pos % W
    rows = []
    for dy in range(3):
        for dx in range(3):
            ry, cx = row + dy - 1, col + dx - 1
            rows.append((ry >= 0) & (ry < H) & (cx >= 0) & (cx < W))
    return jnp.stack(rows, 0).astype(jnp.float32)


# ----------------- shared helper: build the stacked (9*C, H*W) tap operand ---------------
def _stack_patches(y, mask_ref, stack_ref, W):
    """y: (C, H*W) f32 (already BN+ReLU'd).  Writes tap k (= dy*3+dx) of the image as
    rows [k*C, (k+1)*C) of the bf16 stack scratch, so conv = ONE K=9*C MXU matmul."""
    C, HW = y.shape
    for k in range(9):
        dy, dx = divmod(k, 3)
        off = (dy - 1) * W + (dx - 1)
        if off == 0:
            patch = y                                             # center tap: in-bounds
        else:
            # patch[p] = y[p + off], zeroed where the tap falls outside the image.
            patch = pltpu.roll(y, (-off) % HW, axis=1) * mask_ref[pl.ds(k, 1), :]
        stack_ref[pl.ds(k * C, C), :] = patch.astype(jnp.bfloat16)


# ----------------------------------- Pallas kernels --------------------------------------
def stats_kernel(x_ref, out_ref, *, Nb):
    # Per-block partial (sum, sumsq) of x for BN1 batch statistics, packed into (C, 2).
    C = x_ref.shape[1]
    s = jnp.zeros((C, 1), jnp.float32)
    ss = jnp.zeros((C, 1), jnp.float32)
    for i in range(Nb):
        x = x_ref[i].astype(jnp.float32)                          # (C, HW)
        s = s + jnp.sum(x, axis=1, keepdims=True)
        ss = ss + jnp.sum(x * x, axis=1, keepdims=True)
    out_ref[...] = jnp.concatenate([s, ss], axis=1)               # (C, 2)


def conv1_kernel(x_ref, scale_ref, shift_ref, w_ref, mask_ref,
                 h_ref, stats_ref, stack_ref, *, Nb, W):
    # BN1 (folded scale/shift) + ReLU + conv1 as one stacked-K bf16 matmul per image,
    # plus packed per-block partial stats of the conv output for BN2.
    scale = scale_ref[...]
    shift = shift_ref[...]
    wf = w_ref[...]                                               # (Cout, 9*Cin) bf16
    Cout = wf.shape[0]
    s = jnp.zeros((Cout, 1), jnp.float32)
    ss = jnp.zeros((Cout, 1), jnp.float32)
    for i in range(Nb):
        x = x_ref[i].astype(jnp.float32)                          # (Cin, HW)
        y = jnp.maximum(x * scale + shift, 0.0)                   # BN1 + ReLU
        _stack_patches(y, mask_ref, stack_ref, W)
        acc = jnp.dot(wf, stack_ref[...],
                      preferred_element_type=jnp.float32)         # (Cout, HW), f32 acc
        h_ref[i] = acc.astype(jnp.bfloat16)                       # bf16 intermediate
        s = s + jnp.sum(acc, axis=1, keepdims=True)
        ss = ss + jnp.sum(acc * acc, axis=1, keepdims=True)
    stats_ref[...] = jnp.concatenate([s, ss], axis=1)             # one packed store/step


def conv2_kernel(h_ref, x_ref, scale_ref, shift_ref, w_ref, mask_ref,
                 o_ref, stack_ref, *, Nb, W):
    # BN2 (folded) + ReLU + conv2 (stacked-K bf16 matmul) + residual add of raw input.
    scale = scale_ref[...]
    shift = shift_ref[...]
    wf = w_ref[...]                                               # (Cout, 9*Cmid) bf16
    for i in range(Nb):
        h = h_ref[i].astype(jnp.float32)                          # (Cmid, HW)
        y = jnp.maximum(h * scale + shift, 0.0)                   # BN2 + ReLU
        _stack_patches(y, mask_ref, stack_ref, W)
        acc = jnp.dot(wf, stack_ref[...], preferred_element_type=jnp.float32)
        o_ref[i] = (acc + x_ref[i].astype(jnp.float32)).astype(o_ref.dtype)


# --------------------------------- pallas_call wrappers ----------------------------------
def _stats(x3, Nb):
    N, C, HW = x3.shape
    G = N // Nb
    return pl.pallas_call(
        functools.partial(stats_kernel, Nb=Nb),
        out_shape=jax.ShapeDtypeStruct((G, C, 2), jnp.float32),
        grid=(G,),
        in_specs=[pl.BlockSpec((Nb, C, HW), lambda g: (g, 0, 0))],
        out_specs=pl.BlockSpec((None, C, 2), lambda g: (g, 0, 0)),
        compiler_params=_compiler_params(),
    )(x3)


def _conv1(x3, scale1, shift1, w1f, mask, Nb, W):
    N, C, HW = x3.shape
    Cout = w1f.shape[0]
    G = N // Nb
    return pl.pallas_call(
        functools.partial(conv1_kernel, Nb=Nb, W=W),
        out_shape=(jax.ShapeDtypeStruct((N, Cout, HW), jnp.bfloat16),
                   jax.ShapeDtypeStruct((G, Cout, 2), jnp.float32)),
        grid=(G,),
        in_specs=[pl.BlockSpec((Nb, C, HW), lambda g: (g, 0, 0)),
                  pl.BlockSpec((C, 1), lambda g: (0, 0)),
                  pl.BlockSpec((C, 1), lambda g: (0, 0)),
                  pl.BlockSpec((Cout, 9 * C), lambda g: (0, 0)),
                  pl.BlockSpec((9, HW), lambda g: (0, 0))],
        out_specs=(pl.BlockSpec((Nb, Cout, HW), lambda g: (g, 0, 0)),
                   pl.BlockSpec((None, Cout, 2), lambda g: (g, 0, 0))),
        scratch_shapes=[pltpu.VMEM((9 * C, HW), jnp.bfloat16)],
        compiler_params=_compiler_params(),
    )(x3, scale1, shift1, w1f, mask)


def _conv2(h3, x3, scale2, shift2, w2f, mask, Nb, W):
    N, Cmid, HW = h3.shape
    Cin = x3.shape[1]
    Cout = w2f.shape[0]
    G = N // Nb
    return pl.pallas_call(
        functools.partial(conv2_kernel, Nb=Nb, W=W),
        out_shape=jax.ShapeDtypeStruct((N, Cout, HW), jnp.float32),
        grid=(G,),
        in_specs=[pl.BlockSpec((Nb, Cmid, HW), lambda g: (g, 0, 0)),
                  pl.BlockSpec((Nb, Cin, HW), lambda g: (g, 0, 0)),
                  pl.BlockSpec((Cmid, 1), lambda g: (0, 0)),
                  pl.BlockSpec((Cmid, 1), lambda g: (0, 0)),
                  pl.BlockSpec((Cout, 9 * Cmid), lambda g: (0, 0)),
                  pl.BlockSpec((9, HW), lambda g: (0, 0))],
        out_specs=pl.BlockSpec((Nb, Cout, HW), lambda g: (g, 0, 0)),
        scratch_shapes=[pltpu.VMEM((9 * Cmid, HW), jnp.bfloat16)],
        compiler_params=_compiler_params(),
    )(h3, x3, scale2, shift2, w2f, mask)


# ------------------------------------ full forward ---------------------------------------
def _finalize_bn(stats, gamma, beta, count):
    # Fold BN (training-mode batch stats, biased variance) into per-channel scale/shift.
    tot = jnp.sum(stats, axis=0)                                  # (C, 2)
    mean = tot[:, 0:1] / count
    var = jnp.maximum(tot[:, 1:2] / count - mean * mean, 0.0)     # clamp cancellation
    scale = gamma.reshape(-1, 1) * lax.rsqrt(var + EPS)
    shift = beta.reshape(-1, 1) - mean * scale
    return scale, shift


def preact_residual_block(x_nchw, params):
    """Pallas forward of PreActiResidualBlock (stride=1, in_channels == out_channels)."""
    g1, b1, w1, g2, b2, w2 = params               # conv weights: (Cout, Cin, 3, 3) OIHW
    N, C, H, W = x_nchw.shape
    Cout = w1.shape[0]
    HW = H * W
    assert Cout == C, "residual add requires in_channels == out_channels"

    x3 = x_nchw.reshape(N, C, HW).astype(jnp.float32)             # lane-dense, minor=H*W
    Nb = _images_per_block(N, C, HW)

    # conv weights -> (Cout, 9*Cin) bf16, tap-major columns (k = dy*3 + dx)
    w1f = jnp.transpose(w1, (0, 2, 3, 1)).reshape(Cout, 9 * C).astype(jnp.bfloat16)
    w2f = jnp.transpose(w2, (0, 2, 3, 1)).reshape(Cout, 9 * Cout).astype(jnp.bfloat16)

    # zero-halo tap masks, precomputed once and kept VMEM-resident via constant index_map
    mask = _make_tap_masks(H, W)

    # pass 1: BN1 batch statistics (packed per-block partials, tiny finalize in JAX)
    st1 = _stats(x3, Nb)
    scale1, shift1 = _finalize_bn(st1, g1, b1, N * HW)

    # pass 2: BN1+ReLU+conv1 fused; bf16 intermediate + packed partial stats for BN2
    h3, st2 = _conv1(x3, scale1, shift1, w1f, mask, Nb, W)
    scale2, shift2 = _finalize_bn(st2, g2, b2, N * HW)

    # pass 3: BN2+ReLU+conv2 + residual add of the raw input
    out3 = _conv2(h3, x3, scale2, shift2, w2f, mask, Nb, W)
    return out3.reshape(N, Cout, H, W)


# ------------------------------------ JAX reference --------------------------------------
def reference(x, params):
    g1, b1, w1, g2, b2, w2 = params

    def bn(h, g, b):
        m = jnp.mean(h, axis=(0, 2, 3), keepdims=True)
        v = jnp.mean((h - m) ** 2, axis=(0, 2, 3), keepdims=True)
        return (h - m) * lax.rsqrt(v + EPS) * g.reshape(1, -1, 1, 1) + b.reshape(1, -1, 1, 1)

    def conv(h, w):
        return lax.conv_general_dilated(h, w, (1, 1), ((1, 1), (1, 1)),
                                        dimension_numbers=("NCHW", "OIHW", "NCHW"))

    h = jnp.maximum(bn(x, g1, b1), 0.0)
    h = conv(h, w1)
    h = jnp.maximum(bn(h, g2, b2), 0.0)
    h = conv(h, w2)
    return h + x


# ------------------------------------------ main -----------------------------------------
if __name__ == "__main__":
    N, C, H, W = 2, 4, 16, 16          # in_channels = out_channels = 4, stride = 1
    Cout = C

    key = jax.random.PRNGKey(0)
    kx, kw1, kw2, kg1, kb1, kg2, kb2 = jax.random.split(key, 7)

    x = jax.random.normal(kx, (N, C, H, W), jnp.float32)

    # Deterministic parameter init (conv weights OIHW like PyTorch; BN affine per channel).
    w1 = 0.1 * jax.random.normal(kw1, (Cout, C, 3, 3), jnp.float32)
    w2 = 0.1 * jax.random.normal(kw2, (Cout, Cout, 3, 3), jnp.float32)
    g1 = 1.0 + 0.1 * jax.random.normal(kg1, (C,), jnp.float32)
    b1 = 0.1 * jax.random.normal(kb1, (C,), jnp.float32)
    g2 = 1.0 + 0.1 * jax.random.normal(kg2, (Cout,), jnp.float32)
    b2 = 0.1 * jax.random.normal(kb2, (Cout,), jnp.float32)

    params = (g1, b1, w1, g2, b2, w2)

    out = jax.block_until_ready(jax.jit(preact_residual_block)(x, params))
    ref = jax.block_until_ready(reference(x, params))

    assert out.shape == (N, Cout, H, W), out.shape
    max_err = float(jnp.max(jnp.abs(out - ref)))
    # bf16 MXU operands / bf16 intermediate -> relaxed vs. the pure-f32 reference
    assert jnp.allclose(out, ref, atol=5e-2, rtol=5e-2), max_err
    print("KERNEL_OK")
</pallas_src>

<mosaic_0001>
module attributes {stable_mosaic.version = 11 : i64} {
  func.func @stats_kernel(%arg0: i32, %arg1: memref<2x4x256xf32, #tpu.memory_space<vmem>>, %arg2: memref<1x4x2xf32, #tpu.memory_space<vmem>>) attributes {dimension_semantics = [#tpu.dimension_semantics<parallel>], iteration_bounds = array<i64: 1>, scalar_prefetch = 0 : i64, scratch_operands = 0 : i64, tpu.core_type = #tpu.core_type<tc>, window_params = [{transform_indices = @transform_0, window_bounds = array<i64: 2, 4, 256>}, {transform_indices = @transform_1, window_bounds = array<i64: 1, 4, 2>}]} {
    %cst = arith.constant 0.000000e+00 : f32
    %0 = vector.broadcast %cst : f32 to vector<4x1xf32>
    %cst_0 = arith.constant 0.000000e+00 : f32
    %1 = vector.broadcast %cst_0 : f32 to vector<4x1xf32>
    %c0 = arith.constant 0 : index
    %c0_1 = arith.constant 0 : index
    %c0_2 = arith.constant 0 : index
    %2 = vector.load %arg1[%c0, %c0_1, %c0_2] : memref<2x4x256xf32, #tpu.memory_space<vmem>>, vector<1x4x256xf32>
    %3 = vector.shape_cast %2 : vector<1x4x256xf32> to vector<4x256xf32>
    %cst_3 = arith.constant dense<0.000000e+00> : vector<4xf32>
    %4 = vector.multi_reduction <add>, %3, %cst_3 [1] : vector<4x256xf32> to vector<4xf32>
    %5 = vector.shape_cast %4 : vector<4xf32> to vector<4x1xf32>
    %6 = arith.addf %0, %5 : vector<4x1xf32>
    %7 = arith.mulf %3, %3 : vector<4x256xf32>
    %cst_4 = arith.constant dense<0.000000e+00> : vector<4xf32>
    %8 = vector.multi_reduction <add>, %7, %cst_4 [1] : vector<4x256xf32> to vector<4xf32>
    %9 = vector.shape_cast %8 : vector<4xf32> to vector<4x1xf32>
    %10 = arith.addf %1, %9 : vector<4x1xf32>
    %c1 = arith.constant 1 : index
    %c0_5 = arith.constant 0 : index
    %c0_6 = arith.constant 0 : index
    %11 = vector.load %arg1[%c1, %c0_5, %c0_6] : memref<2x4x256xf32, #tpu.memory_space<vmem>>, vector<1x4x256xf32>
    %12 = vector.shape_cast %11 : vector<1x4x256xf32> to vector<4x256xf32>
    %cst_7 = arith.constant dense<0.000000e+00> : vector<4xf32>
    %13 = vector.multi_reduction <add>, %12, %cst_7 [1] : vector<4x256xf32> to vector<4xf32>
    %14 = vector.shape_cast %13 : vector<4xf32> to vector<4x1xf32>
    %15 = arith.addf %6, %14 : vector<4x1xf32>
    %16 = arith.mulf %12, %12 : vector<4x256xf32>
    %cst_8 = arith.constant dense<0.000000e+00> : vector<4xf32>
    %17 = vector.multi_reduction <add>, %16, %cst_8 [1] : vector<4x256xf32> to vector<4xf32>
    %18 = vector.shape_cast %17 : vector<4xf32> to vector<4x1xf32>
    %19 = arith.addf %10, %18 : vector<4x1xf32>
    %20 = tpu.concatenate %15, %19 in 1 : vector<4x1xf32>, vector<4x1xf32> -> vector<4x2xf32>
    %c0_9 = arith.constant 0 : index
    %c0_10 = arith.constant 0 : index
    %c0_11 = arith.constant 0 : index
    %21 = vector.load %arg2[%c0_9, %c0_10, %c0_11] : memref<1x4x2xf32, #tpu.memory_space<vmem>>, vector<1x4x2xf32>
    %22 = vector.shape_cast %21 : vector<1x4x2xf32> to vector<4x2xf32>
    %23 = vector.shape_cast %20 : vector<4x2xf32> to vector<1x4x2xf32>
    tpu.vector_store %arg2[%c0_9, %c0_10, %c0_11], %23 {strides = array<i32>} : memref<1x4x2xf32, #tpu.memory_space<vmem>>, vector<1x4x2xf32>,
    return
  }
  func.func @transform_0(%arg0: i32) -> (i32, i32, i32) {
    %c0_i32 = arith.constant 0 : i32
    %c0_i32_0 = arith.constant 0 : i32
    %c0_i32_1 = arith.constant 0 : i32
    return %arg0, %c0_i32, %c0_i32_0 : i32, i32, i32
  }
  func.func @transform_1(%arg0: i32) -> (i32, i32, i32) {
    %c0_i32 = arith.constant 0 : i32
    %c0_i32_0 = arith.constant 0 : i32
    %c0_i32_1 = arith.constant 0 : i32
    return %arg0, %c0_i32, %c0_i32_0 : i32, i32, i32
  }
}

module attributes {stable_mosaic.version = 11 : i64} {
  func.func @conv1_kernel(%arg0: i32, %arg1: memref<2x4x256xf32, #tpu.memory_space<vmem>>, %arg2: memref<4x1xf32, #tpu.memory_space<vmem>>, %arg3: memref<4x1xf32, #tpu.memory_space<vmem>>, %arg4: memref<4x36xbf16, #tpu.memory_space<vmem>>, %arg5: memref<9x256xf32, #tpu.memory_space<vmem>>, %arg6: memref<2x4x256xbf16, #tpu.memory_space<vmem>>, %arg7: memref<1x4x2xf32, #tpu.memory_space<vmem>>, %arg8: memref<36x256xbf16, #tpu.memory_space<vmem>>) attributes {dimension_semantics = [#tpu.dimension_semantics<parallel>], iteration_bounds = array<i64: 1>, scalar_prefetch = 0 : i64, scratch_operands = 1 : i64, tpu.core_type = #tpu.core_type<tc>, window_params = [{transform_indices = @transform_0, window_bounds = array<i64: 2, 4, 256>}, {pipeline_mode = #tpu.pipeline_mode<synchronous>, transform_indices = @transform_1, window_bounds = array<i64: 4, 1>}, {pipeline_mode = #tpu.pipeline_mode<synchronous>, transform_indices = @transform_2, window_bounds = array<i64: 4, 1>}, {pipeline_mode = #tpu.pipeline_mode<synchronous>, transform_indices = @transform_3, window_bounds = array<i64: 4, 36>}, {pipeline_mode = #tpu.pipeline_mode<synchronous>, transform_indices = @transform_4, window_bounds = array<i64: 9, 256>}, {transform_indices = @transform_5, window_bounds = array<i64: 2, 4, 256>}, {transform_indices = @transform_6, window_bounds = array<i64: 1, 4, 2>}]} {
    %c0 = arith.constant 0 : index
    %c0_0 = arith.constant 0 : index
    %0 = vector.load %arg2[%c0, %c0_0] : memref<4x1xf32, #tpu.memory_space<vmem>>, vector<4x1xf32>
    %c0_1 = arith.constant 0 : index
    %c0_2 = arith.constant 0 : index
    %1 = vector.load %arg3[%c0_1, %c0_2] : memref<4x1xf32, #tpu.memory_space<vmem>>, vector<4x1xf32>
    %c0_3 = arith.constant 0 : index
    %c0_4 = arith.constant 0 : index
    %2 = vector.load %arg4[%c0_3, %c0_4] : memref<4x36xbf16, #tpu.memory_space<vmem>>, vector<4x36xbf16>
    %cst = arith.constant 0.000000e+00 : f32
    %3 = vector.broadcast %cst : f32 to vector<4x1xf32>
    %cst_5 = arith.constant 0.000000e+00 : f32
    %4 = vector.broadcast %cst_5 : f32 to vector<4x1xf32>
    %c0_6 = arith.constant 0 : index
    %c0_7 = arith.constant 0 : index
    %c0_8 = arith.constant 0 : index
    %5 = vector.load %arg1[%c0_6, %c0_7, %c0_8] : memref<2x4x256xf32, #tpu.memory_space<vmem>>, vector<1x4x256xf32>
    %6 = vector.shape_cast %5 : vector<1x4x256xf32> to vector<4x256xf32>
    %7 = vector.broadcast %0 : vector<4x1xf32> to vector<4x256xf32>
    %8 = arith.mulf %6, %7 : vector<4x256xf32>
    %9 = vector.broadcast %1 : vector<4x1xf32> to vector<4x256xf32>
    %10 = arith.addf %8, %9 : vector<4x256xf32>
    %cst_9 = arith.constant 0.000000e+00 : f32
    %11 = vector.broadcast %cst_9 : f32 to vector<4x256xf32>
    %12 = arith.maximumf %10, %11 : vector<4x256xf32>
    %c17_i32 = arith.constant 17 : i32
    %13 = tpu.dynamic_rotate %12 by %c17_i32 dim 1 : vector<4x256xf32>, i32 -> vector<4x256xf32>
    %c0_10 = arith.constant 0 : index
    %c0_11 = arith.constant 0 : index
    %14 = vector.load %arg5[%c0_10, %c0_11] : memref<9x256xf32, #tpu.memory_space<vmem>>, vector<1x256xf32>
    %15 = vector.broadcast %14 : vector<1x256xf32> to vector<4x256xf32>
    %16 = arith.mulf %13, %15 : vector<4x256xf32>
    %17 = arith.truncf %16 : vector<4x256xf32> to vector<4x256xbf16>
    %c0_12 = arith.constant 0 : index
    %c0_13 = arith.constant 0 : index
    %18 = vector.load %arg8[%c0_12, %c0_13] : memref<36x256xbf16, #tpu.memory_space<vmem>>, vector<4x256xbf16>
    tpu.vector_store %arg8[%c0_12, %c0_13], %17 {strides = array<i32>} : memref<36x256xbf16, #tpu.memory_space<vmem>>, vector<4x256xbf16>,
    %c16_i32 = arith.constant 16 : i32
    %19 = tpu.dynamic_rotate %12 by %c16_i32 dim 1 : vector<4x256xf32>, i32 -> vector<4x256xf32>
    %c1 = arith.constant 1 : index
    %c0_14 = arith.constant 0 : index
    %20 = vector.load %arg5[%c1, %c0_14] : memref<9x256xf32, #tpu.memory_space<vmem>>, vector<1x256xf32>
    %21 = vector.broadcast %20 : vector<1x256xf32> to vector<4x256xf32>
    %22 = arith.mulf %19, %21 : vector<4x256xf32>
    %23 = arith.truncf %22 : vector<4x256xf32> to vector<4x256xbf16>
    %c4 = arith.constant 4 : index
    %c0_15 = arith.constant 0 : index
    %24 = vector.load %arg8[%c4, %c0_15] : memref<36x256xbf16, #tpu.memory_space<vmem>>, vector<4x256xbf16>
    tpu.vector_store %arg8[%c4, %c0_15], %23 {strides = array<i32>} : memref<36x256xbf16, #tpu.memory_space<vmem>>, vector<4x256xbf16>,
    %c15_i32 = arith.constant 15 : i32
    %25 = tpu.dynamic_rotate %12 by %c15_i32 dim 1 : vector<4x256xf32>, i32 -> vector<4x256xf32>
    %c2 = arith.constant 2 : index
    %c0_16 = arith.constant 0 : index
    %26 = vector.load %arg5[%c2, %c0_16] : memref<9x256xf32, #tpu.memory_space<vmem>>, vector<1x256xf32>
    %27 = vector.broadcast %26 : vector<1x256xf32> to vector<4x256xf32>
    %28 = arith.mulf %25, %27 : vector<4x256xf32>
    %29 = arith.truncf %28 : vector<4x256xf32> to vector<4x256xbf16>
    %c8 = arith.constant 8 : index
    %c0_17 = arith.constant 0 : index
    %30 = vector.load %arg8[%c8, %c0_17] : memref<36x256xbf16, #tpu.memory_space<vmem>>, vector<4x256xbf16>
    tpu.vector_store %arg8[%c8, %c0_17], %29 {strides = array<i32>} : memref<36x256xbf16, #tpu.memory_space<vmem>>, vector<4x256xbf16>,
    %c1_i32 = arith.constant 1 : i32
    %31 = tpu.dynamic_rotate %12 by %c1_i32 dim 1 : vector<4x256xf32>, i32 -> vector<4x256xf32>
    %c3 = arith.constant 3 : index
    %c0_18 = arith.constant 0 : index
    %32 = vector.load %arg5[%c3, %c0_18] : memref<9x256xf32, #tpu.memory_space<vmem>>, vector<1x256xf32>
    %33 = vector.broadcast %32 : vector<1x256xf32> to vector<4x256xf32>
    %34 = arith.mulf %31, %33 : vector<4x256xf32>
    %35 = arith.truncf %34 : vector<4x256xf32> to vector<4x256xbf16>
    %c12 = arith.constant 12 : index
    %c0_19 = arith.constant 0 : index
    %36 = vector.load %arg8[%c12, %c0_19] : memref<36x256xbf16, #tpu.memory_space<vmem>>, vector<4x256xbf16>
    tpu.vector_store %arg8[%c12, %c0_19], %35 {strides = array<i32>} : memref<36x256xbf16, #tpu.memory_space<vmem>>, vector<4x256xbf16>,
    %37 = arith.truncf %12 : vector<4x256xf32> to vector<4x256xbf16>
    %c16 = arith.constant 16 : index
    %c0_20 = arith.constant 0 : index
    %38 = vector.load %arg8[%c16, %c0_20] : memref<36x256xbf16, #tpu.memory_space<vmem>>, vector<4x256xbf16>
    tpu.vector_store %arg8[%c16, %c0_20], %37 {strides = array<i32>} : memref<36x256xbf16, #tpu.memory_space<vmem>>, vector<4x256xbf16>,
    %c255_i32 = arith.constant 255 : i32
    %39 = tpu.dynamic_rotate %12 by %c255_i32 dim 1 : vector<4x256xf32>, i32 -> vector<4x256xf32>
    %c5 = arith.constant 5 : index
    %c0_21 = arith.constant 0 : index
    %40 = vector.load %arg5[%c5, %c0_21] : memref<9x256xf32, #tpu.memory_space<vmem>>, vector<1x256xf32>
    %41 = vector.broadcast %40 : vector<1x256xf32> to vector<4x256xf32>
    %42 = arith.mulf %39, %41 : vector<4x256xf32>
    %43 = arith.truncf %42 : vector<4x256xf32> to vector<4x256xbf16>
    %c20 = arith.constant 20 : index
    %c0_22 = arith.constant 0 : index
    %44 = vector.load %arg8[%c20, %c0_22] : memref<36x256xbf16, #tpu.memory_space<vmem>>, vector<4x256xbf16>
    tpu.vector_store %arg8[%c20, %c0_22], %43 {strides = array<i32>} : memref<36x256xbf16, #tpu.memory_space<vmem>>, vector<4x256xbf16>,
    %c241_i32 = arith.constant 241 : i32
    %45 = tpu.dynamic_rotate %12 by %c241_i32 dim 1 : vector<4x256xf32>, i32 -> vector<4x256xf32>
    %c6 = arith.constant 6 : index
    %c0_23 = arith.constant 0 : index
    %46 = vector.load %arg5[%c6, %c0_23] : memref<9x256xf32, #tpu.memory_space<vmem>>, vector<1x256xf32>
    %47 = vector.broadcast %46 : vector<1x256xf32> to vector<4x256xf32>
    %48 = arith.mulf %45, %47 : vector<4x256xf32>
    %49 = arith.truncf %48 : vector<4x256xf32> to vector<4x256xbf16>
    %c24 = arith.constant 24 : index
    %c0_24 = arith.constant 0 : index
    %50 = vector.load %arg8[%c24, %c0_24] : memref<36x256xbf16, #tpu.memory_space<vmem>>, vector<4x256xbf16>
    tpu.vector_store %arg8[%c24, %c0_24], %49 {strides = array<i32>} : memref<36x256xbf16, #tpu.memory_space<vmem>>, vector<4x256xbf16>,
    %c240_i32 = arith.constant 240 : i32
    %51 = tpu.dynamic_rotate %12 by %c240_i32 dim 1 : vector<4x256xf32>, i32 -> vector<4x256xf32>
    %c7 = arith.constant 7 : index
    %c0_25 = arith.constant 0 : index
    %52 = vector.load %arg5[%c7, %c0_25] : memref<9x256xf32, #tpu.memory_space<vmem>>, vector<1x256xf32>
    %53 = vector.broadcast %52 : vector<1x256xf32> to vector<4x256xf32>
    %54 = arith.mulf %51, %53 : vector<4x256xf32>
    %55 = arith.truncf %54 : vector<4x256xf32> to vector<4x256xbf16>
    %c28 = arith.constant 28 : index
    %c0_26 = arith.constant 0 : index
    %56 = vector.load %arg8[%c28, %c0_26] : memref<36x256xbf16, #tpu.memory_space<vmem>>, vector<4x256xbf16>
    tpu.vector_store %arg8[%c28, %c0_26], %55 {strides = array<i32>} : memref<36x256xbf16, #tpu.memory_space<vmem>>, vector<4x256xbf16>,
    %c239_i32 = arith.constant 239 : i32
    %57 = tpu.dynamic_rotate %12 by %c239_i32 dim 1 : vector<4x256xf32>, i32 -> vector<4x256xf32>
    %c8_27 = arith.constant 8 : index
    %c0_28 = arith.constant 0 : index
    %58 = vector.load %arg5[%c8_27, %c0_28] : memref<9x256xf32, #tpu.memory_space<vmem>>, vector<1x256xf32>
    %59 = vector.broadcast %58 : vector<1x256xf32> to vector<4x256xf32>
    %60 = arith.mulf %57, %59 : vector<4x256xf32>
    %61 = arith.truncf %60 : vector<4x256xf32> to vector<4x256xbf16>
    %c32 = arith.constant 32 : index
    %c0_29 = arith.constant 0 : index
    %62 = vector.load %arg8[%c32, %c0_29] : memref<36x256xbf16, #tpu.memory_space<vmem>>, vector<4x256xbf16>
    tpu.vector_store %arg8[%c32, %c0_29], %61 {strides = array<i32>} : memref<36x256xbf16, #tpu.memory_space<vmem>>, vector<4x256xbf16>,
    %c0_30 = arith.constant 0 : index
    %c0_31 = arith.constant 0 : index
    %63 = vector.load %arg8[%c0_30, %c0_31] : memref<36x256xbf16, #tpu.memory_space<vmem>>, vector<36x256xbf16>
    %cst_32 = arith.constant dense<0.000000e+00> : vector<4x256xf32>
    %64 = tpu.matmul %2, %63, %cst_32 {dimension_numbers = #tpu.dot_dimension_numbers<[1], [0], [0], [1], [0, 0, 1, 1], [], []>} : vector<4x36xbf16>, vector<36x256xbf16>, vector<4x256xf32> -> vector<4x256xf32>
    %65 = arith.truncf %64 : vector<4x256xf32> to vector<4x256xbf16>
    %c0_33 = arith.constant 0 : index
    %c0_34 = arith.constant 0 : index
    %c0_35 = arith.constant 0 : index
    %66 = vector.load %arg6[%c0_33, %c0_34, %c0_35] : memref<2x4x256xbf16, #tpu.memory_space<vmem>>, vector<1x4x256xbf16>
    %67 = vector.shape_cast %66 : vector<1x4x256xbf16> to vector<4x256xbf16>
    %68 = vector.shape_cast %65 : vector<4x256xbf16> to vector<1x4x256xbf16>
    tpu.vector_store %arg6[%c0_33, %c0_34, %c0_35], %68 {strides = array<i32>} : memref<2x4x256xbf16, #tpu.memory_space<vmem>>, vector<1x4x256xbf16>,
    %cst_36 = arith.constant dense<0.000000e+00> : vector<4xf32>
    %69 = vector.multi_reduction <add>, %64, %cst_36 [1] : vector<4x256xf32> to vector<4xf32>
    %70 = vector.shape_cast %69 : vector<4xf32> to vector<4x1xf32>
    %71 = arith.addf %3, %70 : vector<4x1xf32>
    %72 = arith.mulf %64, %64 : vector<4x256xf32>
    %cst_37 = arith.constant dense<0.000000e+00> : vector<4xf32>
    %73 = vector.multi_reduction <add>, %72, %cst_37 [1] : vector<4x256xf32> to vector<4xf32>
    %74 = vector.shape_cast %73 : vector<4xf32> to vector<4x1xf32>
    %75 = arith.addf %4, %74 : vector<4x1xf32>
    %c1_38 = arith.constant 1 : index
    %c0_39 = arith.constant 0 : index
    %c0_40 = arith.constant 0 : index
    %76 = vector.load %arg1[%c1_38, %c0_39, %c0_40] : memref<2x4x256xf32, #tpu.memory_space<vmem>>, vector<1x4x256xf32>
    %77 = vector.shape_cast %76 : vector<1x4x256xf32> to vector<4x256xf32>
    %78 = vector.broadcast %0 : vector<4x1xf32> to vector<4x256xf32>
    %79 = arith.mulf %77, %78 : vector<4x256xf32>
    %80 = vector.broadcast %1 : vector<4x1xf32> to vector<4x256xf32>
    %81 = arith.addf %79, %80 : vector<4x256xf32>
    %cst_41 = arith.constant 0.000000e+00 : f32
    %82 = vector.broadcast %cst_41 : f32 to vector<4x256xf32>
    %83 = arith.maximumf %81, %82 : vector<4x256xf32>
    %c17_i32_42 = arith.constant 17 : i32
    %84 = tpu.dynamic_rotate %83 by %c17_i32_42 dim 1 : vector<4x256xf32>, i32 -> vector<4x256xf32>
    %c0_43 = arith.constant 0 : index
    %c0_44 = arith.constant 0 : index
    %85 = vector.load %arg5[%c0_43, %c0_44] : memref<9x256xf32, #tpu.memory_space<vmem>>, vector<1x256xf32>
    %86 = vector.broadcast %85 : vector<1x256xf32> to vector<4x256xf32>
    %87 = arith.mulf %84, %86 : vector<4x256xf32>
    %88 = arith.truncf %87 : vector<4x256xf32> to vector<4x256xbf16>
    %c0_45 = arith.constant 0 : index
    %c0_46 = arith.constant 0 : index
    %89 = vector.load %arg8[%c0_45, %c0_46] : memref<36x256xbf16, #tpu.memory_space<vmem>>, vector<4x256xbf16>
    tpu.vector_store %arg8[%c0_45, %c0_46], %88 {strides = array<i32>} : memref<36x256xbf16, #tpu.memory_space<vmem>>, vector<4x256xbf16>,
    %c16_i32_47 = arith.constant 16 : i32
    %90 = tpu.dynamic_rotate %83 by %c16_i32_47 dim 1 : vector<4x256xf32>, i32 -> vector<4x256xf32>
    %c1_48 = arith.constant 1 : index
    %c0_49 = arith.constant 0 : index
    %91 = vector.load %arg5[%c1_48, %c0_49] : memref<9x256xf32, #tpu.memory_space<vmem>>, vector<1x256xf32>
    %92 = vector.broadcast %91 : vector<1x256xf32> to vector<4x256xf32>
    %93 = arith.mulf %90, %92 : vector<4x256xf32>
    %94 = arith.truncf %93 : vector<4x256xf32> to vector<4x256xbf16>
    %c4_50 = arith.constant 4 : index
    %c0_51 = arith.constant 0 : index
    %95 = vector.load %arg8[%c4_50, %c0_51] : memref<36x256xbf16, #tpu.memory_space<vmem>>, vector<4x256xbf16>
    tpu.vector_store %arg8[%c4_50, %c0_51], %94 {strides = array<i32>} : memref<36x256xbf16, #tpu.memory_space<vmem>>, vector<4x256xbf16>,
    %c15_i32_52 = arith.constant 15 : i32
    %96 = tpu.dynamic_rotate %83 by %c15_i32_52 dim 1 : vector<4x256xf32>, i32 -> vector<4x256xf32>
    %c2_53 = arith.constant 2 : index
    %c0_54 = arith.constant 0 : index
    %97 = vector.load %arg5[%c2_53, %c0_54] : memref<9x256xf32, #tpu.memory_space<vmem>>, vector<1x256xf32>
    %98 = vector.broadcast %97 : vector<1x256xf32> to vector<4x256xf32>
    %99 = arith.mulf %96, %98 : vector<4x256xf32>
    %100 = arith.truncf %99 : vector<4x256xf32> to vector<4x256xbf16>
    %c8_55 = arith.constant 8 : index
    %c0_56 = arith.constant 0 : index
    %101 = vector.load %arg8[%c8_55, %c0_56] : memref<36x256xbf16, #tpu.memory_space<vmem>>, vector<4x256xbf16>
    tpu.vector_store %arg8[%c8_55, %c0_56], %100 {strides = array<i32>} : memref<36x256xbf16, #tpu.memory_space<vmem>>, vector<4x256xbf16>,
    %c1_i32_57 = arith.constant 1 : i32
    %102 = tpu.dynamic_rotate %83 by %c1_i32_57 dim 1 : vector<4x256xf32>, i32 -> vector<4x256xf32>
    %c3_58 = arith.constant 3 : index
    %c0_59 = arith.constant 0 : index
    %103 = vector.load %arg5[%c3_58, %c0_59] : memref<9x256xf32, #tpu.memory_space<vmem>>, vector<1x256xf32>
    %104 = vector.broadcast %103 : vector<1x256xf32> to vector<4x256xf32>
    %105 = arith.mulf %102, %104 : vector<4x256xf32>
    %106 = arith.truncf %105 : vector<4x256xf32> to vector<4x256xbf16>
    %c12_60 = arith.constant 12 : index
    %c0_61 = arith.constant 0 : index
    %107 = vector.load %arg8[%c12_60, %c0_61] : memref<36x256xbf16, #tpu.memory_space<vmem>>, vector<4x256xbf16>
    tpu.vector_store %arg8[%c12_60, %c0_61], %106 {strides = array<i32>} : memref<36x256xbf16, #tpu.memory_space<vmem>>, vector<4x256xbf16>,
    %108 = arith.truncf %83 : vector<4x256xf32> to vector<4x256xbf16>
    %c16_62 = arith.constant 16 : index
    %c0_63 = arith.constant 0 : index
    %109 = vector.load %arg8[%c16_62, %c0_63] : memref<36x256xbf16, #tpu.memory_space<vmem>>, vector<4x256xbf16>
    tpu.vector_store %arg8[%c16_62, %c0_63], %108 {strides = array<i32>} : memref<36x256xbf16, #tpu.memory_space<vmem>>, vector<4x256xbf16>,
    %c255_i32_64 = arith.constant 255 : i32
    %110 = tpu.dynamic_rotate %83 by %c255_i32_64 dim 1 : vector<4x256xf32>, i32 -> vector<4x256xf32>
    %c5_65 = arith.constant 5 : index
    %c0_66 = arith.constant 0 : index
    %111 = vector.load %arg5[%c5_65, %c0_66] : memref<9x256xf32, #tpu.memory_space<vmem>>, vector<1x256xf32>
    %112 = vector.broadcast %111 : vector<1x256xf32> to vector<4x256xf32>
    %113 = arith.mulf %110, %112 : vector<4x256xf32>
    %114 = arith.truncf %113 : vector<4x256xf32> to vector<4x256xbf16>
    %c20_67 = arith.constant 20 : index
    %c0_68 = arith.constant 0 : index
    %115 = vector.load %arg8[%c20_67, %c0_68] : memref<36x256xbf16, #tpu.memory_space<vmem>>, vector<4x256xbf16>
    tpu.vector_store %arg8[%c20_67, %c0_68], %114 {strides = array<i32>} : memref<36x256xbf16, #tpu.memory_space<vmem>>, vector<4x256xbf16>,
    %c241_i32_69 = arith.constant 241 : i32
    %116 = tpu.dynamic_rotate %83 by %c241_i32_69 dim 1 : vector<4x256xf32>, i32 -> vector<4x256xf32>
    %c6_70 = arith.constant 6 : index
    %c0_71 = arith.constant 0 : index
    %117 = vector.load %arg5[%c6_70, %c0_71] : memref<9x256xf32, #tpu.memory_space<vmem>>, vector<1x256xf32>
    %118 = vector.broadcast %117 : vector<1x256xf32> to vector<4x256xf32>
    %119 = arith.mulf %116, %118 : vector<4x256xf32>
    %120 = arith.truncf %119 : vector<4x256xf32> to vector<4x256xbf16>
    %c24_72 = arith.constant 24 : index
    %c0_73 = arith.constant 0 : index
    %121 = vector.load %arg8[%c24_72, %c0_73] : memref<36x256xbf16, #tpu.memory_space<vmem>>, vector<4x256xbf16>
    tpu.vector_store %arg8[%c24_72, %c0_73], %120 {strides = array<i32>} : memref<36x256xbf16, #tpu.memory_space<vmem>>, vector<4x256xbf16>,
    %c240_i32_74 = arith.constant 240 : i32
    %122 = tpu.dynamic_rotate %83 by %c240_i32_74 dim 1 : vector<4x256xf32>, i32 -> vector<4x256xf32>
    %c7_75 = arith.constant 7 : index
    %c0_76 = arith.constant 0 : index
    %123 = vector.load %arg5[%c7_75, %c0_76] : memref<9x256xf32, #tpu.memory_space<vmem>>, vector<1x256xf32>
    %124 = vector.broadcast %123 : vector<1x256xf32> to vector<4x256xf32>
    %125 = arith.mulf %122, %124 : vector<4x256xf32>
    %126 = arith.truncf %125 : vector<4x256xf32> to vector<4x256xbf16>
    %c28_77 = arith.constant 28 : index
    %c0_78 = arith.constant 0 : index
    %127 = vector.load %arg8[%c28_77, %c0_78] : memref<36x256xbf16, #tpu.memory_space<vmem>>, vector<4x256xbf16>
    tpu.vector_store %arg8[%c28_77, %c0_78], %126 {strides = array<i32>} : memref<36x256xbf16, #tpu.memory_space<vmem>>, vector<4x256xbf16>,
    %c239_i32_79 = arith.constant 239 : i32
    %128 = tpu.dynamic_rotate %83 by %c239_i32_79 dim 1 : vector<4x256xf32>, i32 -> vector<4x256xf32>
    %c8_80 = arith.constant 8 : index
    %c0_81 = arith.constant 0 : index
    %129 = vector.load %arg5[%c8_80, %c0_81] : memref<9x256xf32, #tpu.memory_space<vmem>>, vector<1x256xf32>
    %130 = vector.broadcast %129 : vector<1x256xf32> to vector<4x256xf32>
    %131 = arith.mulf %128, %130 : vector<4x256xf32>
    %132 = arith.truncf %131 : vector<4x256xf32> to vector<4x256xbf16>
    %c32_82 = arith.constant 32 : index
    %c0_83 = arith.constant 0 : index
    %133 = vector.load %arg8[%c32_82, %c0_83] : memref<36x256xbf16, #tpu.memory_space<vmem>>, vector<4x256xbf16>
    tpu.vector_store %arg8[%c32_82, %c0_83], %132 {strides = array<i32>} : memref<36x256xbf16, #tpu.memory_space<vmem>>, vector<4x256xbf16>,
    %c0_84 = arith.constant 0 : index
    %c0_85 = arith.constant 0 : index
    %134 = vector.load %arg8[%c0_84, %c0_85] : memref<36x256xbf16, #tpu.memory_space<vmem>>, vector<36x256xbf16>
    %cst_86 = arith.constant dense<0.000000e+00> : vector<4x256xf32>
    %135 = tpu.matmul %2, %134, %cst_86 {dimension_numbers = #tpu.dot_dimension_numbers<[1], [0], [0], [1], [0, 0, 1, 1], [], []>} : vector<4x36xbf16>, vector<36x256xbf16>, vector<4x256xf32> -> vector<4x256xf32>
    %136 = arith.truncf %135 : vector<4x256xf32> to vector<4x256xbf16>
    %c1_87 = arith.constant 1 : index
    %c0_88 = arith.constant 0 : index
    %c0_89 = arith.constant 0 : index
    %137 = vector.load %arg6[%c1_87, %c0_88, %c0_89] : memref<2x4x256xbf16, #tpu.memory_space<vmem>>, vector<1x4x256xbf16>
    %138 = vector.shape_cast %137 : vector<1x4x256xbf16> to vector<4x256xbf16>
    %139 = vector.shape_cast %136 : vector<4x256xbf16> to vector<1x4x256xbf16>
    tpu.vector_store %arg6[%c1_87, %c0_88, %c0_89], %139 {strides = array<i32>} : memref<2x4x256xbf16, #tpu.memory_space<vmem>>, vector<1x4x256xbf16>,
    %cst_90 = arith.constant dense<0.000000e+00> : vector<4xf32>
    %140 = vector.multi_reduction <add>, %135, %cst_90 [1] : vector<4x256xf32> to vector<4xf32>
    %141 = vector.shape_cast %140 : vector<4xf32> to vector<4x1xf32>
    %142 = arith.addf %71, %141 : vector<4x1xf32>
    %143 = arith.mulf %135, %135 : vector<4x256xf32>
    %cst_91 = arith.constant dense<0.000000e+00> : vector<4xf32>
    %144 = vector.multi_reduction <add>, %143, %cst_91 [1] : vector<4x256xf32> to vector<4xf32>
    %145 = vector.shape_cast %144 : vector<4xf32> to vector<4x1xf32>
    %146 = arith.addf %75, %145 : vector<4x1xf32>
    %147 = tpu.concatenate %142, %146 in 1 : vector<4x1xf32>, vector<4x1xf32> -> vector<4x2xf32>
    %c0_92 = arith.constant 0 : index
    %c0_93 = arith.constant 0 : index
    %c0_94 = arith.constant 0 : index
    %148 = vector.load %arg7[%c0_92, %c0_93, %c0_94] : memref<1x4x2xf32, #tpu.memory_space<vmem>>, vector<1x4x2xf32>
    %149 = vector.shape_cast %148 : vector<1x4x2xf32> to vector<4x2xf32>
    %150 = vector.shape_cast %147 : vector<4x2xf32> to vector<1x4x2xf32>
    tpu.vector_store %arg7[%c0_92, %c0_93, %c0_94], %150 {strides = array<i32>} : memref<1x4x2xf32, #tpu.memory_space<vmem>>, vector<1x4x2xf32>,
    return
  }
  func.func @transform_0(%arg0: i32) -> (i32, i32, i32) {
    %c0_i32 = arith.constant 0 : i32
    %c0_i32_0 = arith.constant 0 : i32
    %c0_i32_1 = arith.constant 0 : i32
    return %arg0, %c0_i32, %c0_i32_0 : i32, i32, i32
  }
  func.func @transform_1(%arg0: i32) -> (i32, i32) {
    %c0_i32 = arith.constant 0 : i32
    %c0_i32_0 = arith.constant 0 : i32
    %c0_i32_1 = arith.constant 0 : i32
    return %c0_i32, %c0_i32_0 : i32, i32
  }
  func.func @transform_2(%arg0: i32) -> (i32, i32) {
    %c0_i32 = arith.constant 0 : i32
    %c0_i32_0 = arith.constant 0 : i32
    %c0_i32_1 = arith.constant 0 : i32
    return %c0_i32, %c0_i32_0 : i32, i32
  }
  func.func @transform_3(%arg0: i32) -> (i32, i32) {
    %c0_i32 = arith.constant 0 : i32
    %c0_i32_0 = arith.constant 0 : i32
    %c0_i32_1 = arith.constant 0 : i32
    return %c0_i32, %c0_i32_0 : i32, i32
  }
  func.func @transform_4(%arg0: i32) -> (i32, i32) {
    %c0_i32 = arith.constant 0 : i32
    %c0_i32_0 = arith.constant 0 : i32
    %c0_i32_1 = arith.constant 0 : i32
    return %c0_i32, %c0_i32_0 : i32, i32
  }
  func.func @transform_5(%arg0: i32) -> (i32, i32, i32) {
    %c0_i32 = arith.constant 0 : i32
    %c0_i32_0 = arith.constant 0 : i32
    %c0_i32_1 = arith.constant 0 : i32
    return %arg0, %c0_i32, %c0_i32_0 : i32, i32, i32
  }
  func.func @transform_6(%arg0: i32) -> (i32, i32, i32) {
    %c0_i32 = arith.constant 0 : i32
    %c0_i32_0 = arith.constant 0 : i32
    %c0_i32_1 = arith.constant 0 : i32
    return %arg0, %c0_i32, %c0_i32_0 : i32, i32, i32
  }
}

module attributes {stable_mosaic.version = 11 : i64} {
  func.func @conv2_kernel(%arg0: i32, %arg1: memref<2x4x256xbf16, #tpu.memory_space<vmem>>, %arg2: memref<2x4x256xf32, #tpu.memory_space<vmem>>, %arg3: memref<4x1xf32, #tpu.memory_space<vmem>>, %arg4: memref<4x1xf32, #tpu.memory_space<vmem>>, %arg5: memref<4x36xbf16, #tpu.memory_space<vmem>>, %arg6: memref<9x256xf32, #tpu.memory_space<vmem>>, %arg7: memref<2x4x256xf32, #tpu.memory_space<vmem>>, %arg8: memref<36x256xbf16, #tpu.memory_space<vmem>>) attributes {dimension_semantics = [#tpu.dimension_semantics<parallel>], iteration_bounds = array<i64: 1>, scalar_prefetch = 0 : i64, scratch_operands = 1 : i64, tpu.core_type = #tpu.core_type<tc>, window_params = [{transform_indices = @transform_0, window_bounds = array<i64: 2, 4, 256>}, {transform_indices = @transform_1, window_bounds = array<i64: 2, 4, 256>}, {pipeline_mode = #tpu.pipeline_mode<synchronous>, transform_indices = @transform_2, window_bounds = array<i64: 4, 1>}, {pipeline_mode = #tpu.pipeline_mode<synchronous>, transform_indices = @transform_3, window_bounds = array<i64: 4, 1>}, {pipeline_mode = #tpu.pipeline_mode<synchronous>, transform_indices = @transform_4, window_bounds = array<i64: 4, 36>}, {pipeline_mode = #tpu.pipeline_mode<synchronous>, transform_indices = @transform_5, window_bounds = array<i64: 9, 256>}, {transform_indices = @transform_6, window_bounds = array<i64: 2, 4, 256>}]} {
    %c0 = arith.constant 0 : index
    %c0_0 = arith.constant 0 : index
    %0 = vector.load %arg3[%c0, %c0_0] : memref<4x1xf32, #tpu.memory_space<vmem>>, vector<4x1xf32>
    %c0_1 = arith.constant 0 : index
    %c0_2 = arith.constant 0 : index
    %1 = vector.load %arg4[%c0_1, %c0_2] : memref<4x1xf32, #tpu.memory_space<vmem>>, vector<4x1xf32>
    %c0_3 = arith.constant 0 : index
    %c0_4 = arith.constant 0 : index
    %2 = vector.load %arg5[%c0_3, %c0_4] : memref<4x36xbf16, #tpu.memory_space<vmem>>, vector<4x36xbf16>
    %c0_5 = arith.constant 0 : index
    %c0_6 = arith.constant 0 : index
    %c0_7 = arith.constant 0 : index
    %3 = vector.load %arg1[%c0_5, %c0_6, %c0_7] : memref<2x4x256xbf16, #tpu.memory_space<vmem>>, vector<1x4x256xbf16>
    %4 = vector.shape_cast %3 : vector<1x4x256xbf16> to vector<4x256xbf16>
    %5 = arith.extf %4 : vector<4x256xbf16> to vector<4x256xf32>
    %6 = vector.broadcast %0 : vector<4x1xf32> to vector<4x256xf32>
    %7 = arith.mulf %5, %6 : vector<4x256xf32>
    %8 = vector.broadcast %1 : vector<4x1xf32> to vector<4x256xf32>
    %9 = arith.addf %7, %8 : vector<4x256xf32>
    %cst = arith.constant 0.000000e+00 : f32
    %10 = vector.broadcast %cst : f32 to vector<4x256xf32>
    %11 = arith.maximumf %9, %10 : vector<4x256xf32>
    %c17_i32 = arith.constant 17 : i32
    %12 = tpu.dynamic_rotate %11 by %c17_i32 dim 1 : vector<4x256xf32>, i32 -> vector<4x256xf32>
    %c0_8 = arith.constant 0 : index
    %c0_9 = arith.constant 0 : index
    %13 = vector.load %arg6[%c0_8, %c0_9] : memref<9x256xf32, #tpu.memory_space<vmem>>, vector<1x256xf32>
    %14 = vector.broadcast %13 : vector<1x256xf32> to vector<4x256xf32>
    %15 = arith.mulf %12, %14 : vector<4x256xf32>
    %16 = arith.truncf %15 : vector<4x256xf32> to vector<4x256xbf16>
    %c0_10 = arith.constant 0 : index
    %c0_11 = arith.constant 0 : index
    %17 = vector.load %arg8[%c0_10, %c0_11] : memref<36x256xbf16, #tpu.memory_space<vmem>>, vector<4x256xbf16>
    tpu.vector_store %arg8[%c0_10, %c0_11], %16 {strides = array<i32>} : memref<36x256xbf16, #tpu.memory_space<vmem>>, vector<4x256xbf16>,
    %c16_i32 = arith.constant 16 : i32
    %18 = tpu.dynamic_rotate %11 by %c16_i32 dim 1 : vector<4x256xf32>, i32 -> vector<4x256xf32>
    %c1 = arith.constant 1 : index
    %c0_12 = arith.constant 0 : index
    %19 = vector.load %arg6[%c1, %c0_12] : memref<9x256xf32, #tpu.memory_space<vmem>>, vector<1x256xf32>
    %20 = vector.broadcast %19 : vector<1x256xf32> to vector<4x256xf32>
    %21 = arith.mulf %18, %20 : vector<4x256xf32>
    %22 = arith.truncf %21 : vector<4x256xf32> to vector<4x256xbf16>
    %c4 = arith.constant 4 : index
    %c0_13 = arith.constant 0 : index
    %23 = vector.load %arg8[%c4, %c0_13] : memref<36x256xbf16, #tpu.memory_space<vmem>>, vector<4x256xbf16>
    tpu.vector_store %arg8[%c4, %c0_13], %22 {strides = array<i32>} : memref<36x256xbf16, #tpu.memory_space<vmem>>, vector<4x256xbf16>,
    %c15_i32 = arith.constant 15 : i32
    %24 = tpu.dynamic_rotate %11 by %c15_i32 dim 1 : vector<4x256xf32>, i32 -> vector<4x256xf32>
    %c2 = arith.constant 2 : index
    %c0_14 = arith.constant 0 : index
    %25 = vector.load %arg6[%c2, %c0_14] : memref<9x256xf32, #tpu.memory_space<vmem>>, vector<1x256xf32>
    %26 = vector.broadcast %25 : vector<1x256xf32> to vector<4x256xf32>
    %27 = arith.mulf %24, %26 : vector<4x256xf32>
    %28 = arith.truncf %27 : vector<4x256xf32> to vector<4x256xbf16>
    %c8 = arith.constant 8 : index
    %c0_15 = arith.constant 0 : index
    %29 = vector.load %arg8[%c8, %c0_15] : memref<36x256xbf16, #tpu.memory_space<vmem>>, vector<4x256xbf16>
    tpu.vector_store %arg8[%c8, %c0_15], %28 {strides = array<i32>} : memref<36x256xbf16, #tpu.memory_space<vmem>>, vector<4x256xbf16>,
    %c1_i32 = arith.constant 1 : i32
    %30 = tpu.dynamic_rotate %11 by %c1_i32 dim 1 : vector<4x256xf32>, i32 -> vector<4x256xf32>
    %c3 = arith.constant 3 : index
    %c0_16 = arith.constant 0 : index
    %31 = vector.load %arg6[%c3, %c0_16] : memref<9x256xf32, #tpu.memory_space<vmem>>, vector<1x256xf32>
    %32 = vector.broadcast %31 : vector<1x256xf32> to vector<4x256xf32>
    %33 = arith.mulf %30, %32 : vector<4x256xf32>
    %34 = arith.truncf %33 : vector<4x256xf32> to vector<4x256xbf16>
    %c12 = arith.constant 12 : index
    %c0_17 = arith.constant 0 : index
    %35 = vector.load %arg8[%c12, %c0_17] : memref<36x256xbf16, #tpu.memory_space<vmem>>, vector<4x256xbf16>
    tpu.vector_store %arg8[%c12, %c0_17], %34 {strides = array<i32>} : memref<36x256xbf16, #tpu.memory_space<vmem>>, vector<4x256xbf16>,
    %36 = arith.truncf %11 : vector<4x256xf32> to vector<4x256xbf16>
    %c16 = arith.constant 16 : index
    %c0_18 = arith.constant 0 : index
    %37 = vector.load %arg8[%c16, %c0_18] : memref<36x256xbf16, #tpu.memory_space<vmem>>, vector<4x256xbf16>
    tpu.vector_store %arg8[%c16, %c0_18], %36 {strides = array<i32>} : memref<36x256xbf16, #tpu.memory_space<vmem>>, vector<4x256xbf16>,
    %c255_i32 = arith.constant 255 : i32
    %38 = tpu.dynamic_rotate %11 by %c255_i32 dim 1 : vector<4x256xf32>, i32 -> vector<4x256xf32>
    %c5 = arith.constant 5 : index
    %c0_19 = arith.constant 0 : index
    %39 = vector.load %arg6[%c5, %c0_19] : memref<9x256xf32, #tpu.memory_space<vmem>>, vector<1x256xf32>
    %40 = vector.broadcast %39 : vector<1x256xf32> to vector<4x256xf32>
    %41 = arith.mulf %38, %40 : vector<4x256xf32>
    %42 = arith.truncf %41 : vector<4x256xf32> to vector<4x256xbf16>
    %c20 = arith.constant 20 : index
    %c0_20 = arith.constant 0 : index
    %43 = vector.load %arg8[%c20, %c0_20] : memref<36x256xbf16, #tpu.memory_space<vmem>>, vector<4x256xbf16>
    tpu.vector_store %arg8[%c20, %c0_20], %42 {strides = array<i32>} : memref<36x256xbf16, #tpu.memory_space<vmem>>, vector<4x256xbf16>,
    %c241_i32 = arith.constant 241 : i32
    %44 = tpu.dynamic_rotate %11 by %c241_i32 dim 1 : vector<4x256xf32>, i32 -> vector<4x256xf32>
    %c6 = arith.constant 6 : index
    %c0_21 = arith.constant 0 : index
    %45 = vector.load %arg6[%c6, %c0_21] : memref<9x256xf32, #tpu.memory_space<vmem>>, vector<1x256xf32>
    %46 = vector.broadcast %45 : vector<1x256xf32> to vector<4x256xf32>
    %47 = arith.mulf %44, %46 : vector<4x256xf32>
    %48 = arith.truncf %47 : vector<4x256xf32> to vector<4x256xbf16>
    %c24 = arith.constant 24 : index
    %c0_22 = arith.constant 0 : index
    %49 = vector.load %arg8[%c24, %c0_22] : memref<36x256xbf16, #tpu.memory_space<vmem>>, vector<4x256xbf16>
    tpu.vector_store %arg8[%c24, %c0_22], %48 {strides = array<i32>} : memref<36x256xbf16, #tpu.memory_space<vmem>>, vector<4x256xbf16>,
    %c240_i32 = arith.constant 240 : i32
    %50 = tpu.dynamic_rotate %11 by %c240_i32 dim 1 : vector<4x256xf32>, i32 -> vector<4x256xf32>
    %c7 = arith.constant 7 : index
    %c0_23 = arith.constant 0 : index
    %51 = vector.load %arg6[%c7, %c0_23] : memref<9x256xf32, #tpu.memory_space<vmem>>, vector<1x256xf32>
    %52 = vector.broadcast %51 : vector<1x256xf32> to vector<4x256xf32>
    %53 = arith.mulf %50, %52 : vector<4x256xf32>
    %54 = arith.truncf %53 : vector<4x256xf32> to vector<4x256xbf16>
    %c28 = arith.constant 28 : index
    %c0_24 = arith.constant 0 : index
    %55 = vector.load %arg8[%c28, %c0_24] : memref<36x256xbf16, #tpu.memory_space<vmem>>, vector<4x256xbf16>
    tpu.vector_store %arg8[%c28, %c0_24], %54 {strides = array<i32>} : memref<36x256xbf16, #tpu.memory_space<vmem>>, vector<4x256xbf16>,
    %c239_i32 = arith.constant 239 : i32
    %56 = tpu.dynamic_rotate %11 by %c239_i32 dim 1 : vector<4x256xf32>, i32 -> vector<4x256xf32>
    %c8_25 = arith.constant 8 : index
    %c0_26 = arith.constant 0 : index
    %57 = vector.load %arg6[%c8_25, %c0_26] : memref<9x256xf32, #tpu.memory_space<vmem>>, vector<1x256xf32>
    %58 = vector.broadcast %57 : vector<1x256xf32> to vector<4x256xf32>
    %59 = arith.mulf %56, %58 : vector<4x256xf32>
    %60 = arith.truncf %59 : vector<4x256xf32> to vector<4x256xbf16>
    %c32 = arith.constant 32 : index
    %c0_27 = arith.constant 0 : index
    %61 = vector.load %arg8[%c32, %c0_27] : memref<36x256xbf16, #tpu.memory_space<vmem>>, vector<4x256xbf16>
    tpu.vector_store %arg8[%c32, %c0_27], %60 {strides = array<i32>} : memref<36x256xbf16, #tpu.memory_space<vmem>>, vector<4x256xbf16>,
    %c0_28 = arith.constant 0 : index
    %c0_29 = arith.constant 0 : index
    %62 = vector.load %arg8[%c0_28, %c0_29] : memref<36x256xbf16, #tpu.memory_space<vmem>>, vector<36x256xbf16>
    %cst_30 = arith.constant dense<0.000000e+00> : vector<4x256xf32>
    %63 = tpu.matmul %2, %62, %cst_30 {dimension_numbers = #tpu.dot_dimension_numbers<[1], [0], [0], [1], [0, 0, 1, 1], [], []>} : vector<4x36xbf16>, vector<36x256xbf16>, vector<4x256xf32> -> vector<4x256xf32>
    %c0_31 = arith.constant 0 : index
    %c0_32 = arith.constant 0 : index
    %c0_33 = arith.constant 0 : index
    %64 = vector.load %arg2[%c0_31, %c0_32, %c0_33] : memref<2x4x256xf32, #tpu.memory_space<vmem>>, vector<1x4x256xf32>
    %65 = vector.shape_cast %64 : vector<1x4x256xf32> to vector<4x256xf32>
    %66 = arith.addf %63, %65 : vector<4x256xf32>
    %c0_34 = arith.constant 0 : index
    %c0_35 = arith.constant 0 : index
    %c0_36 = arith.constant 0 : index
    %67 = vector.load %arg7[%c0_34, %c0_35, %c0_36] : memref<2x4x256xf32, #tpu.memory_space<vmem>>, vector<1x4x256xf32>
    %68 = vector.shape_cast %67 : vector<1x4x256xf32> to vector<4x256xf32>
    %69 = vector.shape_cast %66 : vector<4x256xf32> to vector<1x4x256xf32>
    tpu.vector_store %arg7[%c0_34, %c0_35, %c0_36], %69 {strides = array<i32>} : memref<2x4x256xf32, #tpu.memory_space<vmem>>, vector<1x4x256xf32>,
    %c1_37 = arith.constant 1 : index
    %c0_38 = arith.constant 0 : index
    %c0_39 = arith.constant 0 : index
    %70 = vector.load %arg1[%c1_37, %c0_38, %c0_39] : memref<2x4x256xbf16, #tpu.memory_space<vmem>>, vector<1x4x256xbf16>
    %71 = vector.shape_cast %70 : vector<1x4x256xbf16> to vector<4x256xbf16>
    %72 = arith.extf %71 : vector<4x256xbf16> to vector<4x256xf32>
    %73 = vector.broadcast %0 : vector<4x1xf32> to vector<4x256xf32>
    %74 = arith.mulf %72, %73 : vector<4x256xf32>
    %75 = vector.broadcast %1 : vector<4x1xf32> to vector<4x256xf32>
    %76 = arith.addf %74, %75 : vector<4x256xf32>
    %cst_40 = arith.constant 0.000000e+00 : f32
    %77 = vector.broadcast %cst_40 : f32 to vector<4x256xf32>
    %78 = arith.maximumf %76, %77 : vector<4x256xf32>
    %c17_i32_41 = arith.constant 17 : i32
    %79 = tpu.dynamic_rotate %78 by %c17_i32_41 dim 1 : vector<4x256xf32>, i32 -> vector<4x256xf32>
    %c0_42 = arith.constant 0 : index
    %c0_43 = arith.constant 0 : index
    %80 = vector.load %arg6[%c0_42, %c0_43] : memref<9x256xf32, #tpu.memory_space<vmem>>, vector<1x256xf32>
    %81 = vector.broadcast %80 : vector<1x256xf32> to vector<4x256xf32>
    %82 = arith.mulf %79, %81 : vector<4x256xf32>
    %83 = arith.truncf %82 : vector<4x256xf32> to vector<4x256xbf16>
    %c0_44 = arith.constant 0 : index
    %c0_45 = arith.constant 0 : index
    %84 = vector.load %arg8[%c0_44, %c0_45] : memref<36x256xbf16, #tpu.memory_space<vmem>>, vector<4x256xbf16>
    tpu.vector_store %arg8[%c0_44, %c0_45], %83 {strides = array<i32>} : memref<36x256xbf16, #tpu.memory_space<vmem>>, vector<4x256xbf16>,
    %c16_i32_46 = arith.constant 16 : i32
    %85 = tpu.dynamic_rotate %78 by %c16_i32_46 dim 1 : vector<4x256xf32>, i32 -> vector<4x256xf32>
    %c1_47 = arith.constant 1 : index
    %c0_48 = arith.constant 0 : index
    %86 = vector.load %arg6[%c1_47, %c0_48] : memref<9x256xf32, #tpu.memory_space<vmem>>, vector<1x256xf32>
    %87 = vector.broadcast %86 : vector<1x256xf32> to vector<4x256xf32>
    %88 = arith.mulf %85, %87 : vector<4x256xf32>
    %89 = arith.truncf %88 : vector<4x256xf32> to vector<4x256xbf16>
    %c4_49 = arith.constant 4 : index
    %c0_50 = arith.constant 0 : index
    %90 = vector.load %arg8[%c4_49, %c0_50] : memref<36x256xbf16, #tpu.memory_space<vmem>>, vector<4x256xbf16>
    tpu.vector_store %arg8[%c4_49, %c0_50], %89 {strides = array<i32>} : memref<36x256xbf16, #tpu.memory_space<vmem>>, vector<4x256xbf16>,
    %c15_i32_51 = arith.constant 15 : i32
    %91 = tpu.dynamic_rotate %78 by %c15_i32_51 dim 1 : vector<4x256xf32>, i32 -> vector<4x256xf32>
    %c2_52 = arith.constant 2 : index
    %c0_53 = arith.constant 0 : index
    %92 = vector.load %arg6[%c2_52, %c0_53] : memref<9x256xf32, #tpu.memory_space<vmem>>, vector<1x256xf32>
    %93 = vector.broadcast %92 : vector<1x256xf32> to vector<4x256xf32>
    %94 = arith.mulf %91, %93 : vector<4x256xf32>
    %95 = arith.truncf %94 : vector<4x256xf32> to vector<4x256xbf16>
    %c8_54 = arith.constant 8 : index
    %c0_55 = arith.constant 0 : index
    %96 = vector.load %arg8[%c8_54, %c0_55] : memref<36x256xbf16, #tpu.memory_space<vmem>>, vector<4x256xbf16>
    tpu.vector_store %arg8[%c8_54, %c0_55], %95 {strides = array<i32>} : memref<36x256xbf16, #tpu.memory_space<vmem>>, vector<4x256xbf16>,
    %c1_i32_56 = arith.constant 1 : i32
    %97 = tpu.dynamic_rotate %78 by %c1_i32_56 dim 1 : vector<4x256xf32>, i32 -> vector<4x256xf32>
    %c3_57 = arith.constant 3 : index
    %c0_58 = arith.constant 0 : index
    %98 = vector.load %arg6[%c3_57, %c0_58] : memref<9x256xf32, #tpu.memory_space<vmem>>, vector<1x256xf32>
    %99 = vector.broadcast %98 : vector<1x256xf32> to vector<4x256xf32>
    %100 = arith.mulf %97, %99 : vector<4x256xf32>
    %101 = arith.truncf %100 : vector<4x256xf32> to vector<4x256xbf16>
    %c12_59 = arith.constant 12 : index
    %c0_60 = arith.constant 0 : index
    %102 = vector.load %arg8[%c12_59, %c0_60] : memref<36x256xbf16, #tpu.memory_space<vmem>>, vector<4x256xbf16>
    tpu.vector_store %arg8[%c12_59, %c0_60], %101 {strides = array<i32>} : memref<36x256xbf16, #tpu.memory_space<vmem>>, vector<4x256xbf16>,
    %103 = arith.truncf %78 : vector<4x256xf32> to vector<4x256xbf16>
    %c16_61 = arith.constant 16 : index
    %c0_62 = arith.constant 0 : index
    %104 = vector.load %arg8[%c16_61, %c0_62] : memref<36x256xbf16, #tpu.memory_space<vmem>>, vector<4x256xbf16>
    tpu.vector_store %arg8[%c16_61, %c0_62], %103 {strides = array<i32>} : memref<36x256xbf16, #tpu.memory_space<vmem>>, vector<4x256xbf16>,
    %c255_i32_63 = arith.constant 255 : i32
    %105 = tpu.dynamic_rotate %78 by %c255_i32_63 dim 1 : vector<4x256xf32>, i32 -> vector<4x256xf32>
    %c5_64 = arith.constant 5 : index
    %c0_65 = arith.constant 0 : index
    %106 = vector.load %arg6[%c5_64, %c0_65] : memref<9x256xf32, #tpu.memory_space<vmem>>, vector<1x256xf32>
    %107 = vector.broadcast %106 : vector<1x256xf32> to vector<4x256xf32>
    %108 = arith.mulf %105, %107 : vector<4x256xf32>
    %109 = arith.truncf %108 : vector<4x256xf32> to vector<4x256xbf16>
    %c20_66 = arith.constant 20 : index
    %c0_67 = arith.constant 0 : index
    %110 = vector.load %arg8[%c20_66, %c0_67] : memref<36x256xbf16, #tpu.memory_space<vmem>>, vector<4x256xbf16>
    tpu.vector_store %arg8[%c20_66, %c0_67], %109 {strides = array<i32>} : memref<36x256xbf16, #tpu.memory_space<vmem>>, vector<4x256xbf16>,
    %c241_i32_68 = arith.constant 241 : i32
    %111 = tpu.dynamic_rotate %78 by %c241_i32_68 dim 1 : vector<4x256xf32>, i32 -> vector<4x256xf32>
    %c6_69 = arith.constant 6 : index
    %c0_70 = arith.constant 0 : index
    %112 = vector.load %arg6[%c6_69, %c0_70] : memref<9x256xf32, #tpu.memory_space<vmem>>, vector<1x256xf32>
    %113 = vector.broadcast %112 : vector<1x256xf32> to vector<4x256xf32>
    %114 = arith.mulf %111, %113 : vector<4x256xf32>
    %115 = arith.truncf %114 : vector<4x256xf32> to vector<4x256xbf16>
    %c24_71 = arith.constant 24 : index
    %c0_72 = arith.constant 0 : index
    %116 = vector.load %arg8[%c24_71, %c0_72] : memref<36x256xbf16, #tpu.memory_space<vmem>>, vector<4x256xbf16>
    tpu.vector_store %arg8[%c24_71, %c0_72], %115 {strides = array<i32>} : memref<36x256xbf16, #tpu.memory_space<vmem>>, vector<4x256xbf16>,
    %c240_i32_73 = arith.constant 240 : i32
    %117 = tpu.dynamic_rotate %78 by %c240_i32_73 dim 1 : vector<4x256xf32>, i32 -> vector<4x256xf32>
    %c7_74 = arith.constant 7 : index
    %c0_75 = arith.constant 0 : index
    %118 = vector.load %arg6[%c7_74, %c0_75] : memref<9x256xf32, #tpu.memory_space<vmem>>, vector<1x256xf32>
    %119 = vector.broadcast %118 : vector<1x256xf32> to vector<4x256xf32>
    %120 = arith.mulf %117, %119 : vector<4x256xf32>
    %121 = arith.truncf %120 : vector<4x256xf32> to vector<4x256xbf16>
    %c28_76 = arith.constant 28 : index
    %c0_77 = arith.constant 0 : index
    %122 = vector.load %arg8[%c28_76, %c0_77] : memref<36x256xbf16, #tpu.memory_space<vmem>>, vector<4x256xbf16>
    tpu.vector_store %arg8[%c28_76, %c0_77], %121 {strides = array<i32>} : memref<36x256xbf16, #tpu.memory_space<vmem>>, vector<4x256xbf16>,
    %c239_i32_78 = arith.constant 239 : i32
    %123 = tpu.dynamic_rotate %78 by %c239_i32_78 dim 1 : vector<4x256xf32>, i32 -> vector<4x256xf32>
    %c8_79 = arith.constant 8 : index
    %c0_80 = arith.constant 0 : index
    %124 = vector.load %arg6[%c8_79, %c0_80] : memref<9x256xf32, #tpu.memory_space<vmem>>, vector<1x256xf32>
    %125 = vector.broadcast %124 : vector<1x256xf32> to vector<4x256xf32>
    %126 = arith.mulf %123, %125 : vector<4x256xf32>
    %127 = arith.truncf %126 : vector<4x256xf32> to vector<4x256xbf16>
    %c32_81 = arith.constant 32 : index
    %c0_82 = arith.constant 0 : index
    %128 = vector.load %arg8[%c32_81, %c0_82] : memref<36x256xbf16, #tpu.memory_space<vmem>>, vector<4x256xbf16>
    tpu.vector_store %arg8[%c32_81, %c0_82], %127 {strides = array<i32>} : memref<36x256xbf16, #tpu.memory_space<vmem>>, vector<4x256xbf16>,
    %c0_83 = arith.constant 0 : index
    %c0_84 = arith.constant 0 : index
    %129 = vector.load %arg8[%c0_83, %c0_84] : memref<36x256xbf16, #tpu.memory_space<vmem>>, vector<36x256xbf16>
    %cst_85 = arith.constant dense<0.000000e+00> : vector<4x256xf32>
    %130 = tpu.matmul %2, %129, %cst_85 {dimension_numbers = #tpu.dot_dimension_numbers<[1], [0], [0], [1], [0, 0, 1, 1], [], []>} : vector<4x36xbf16>, vector<36x256xbf16>, vector<4x256xf32> -> vector<4x256xf32>
    %c1_86 = arith.constant 1 : index
    %c0_87 = arith.constant 0 : index
    %c0_88 = arith.constant 0 : index
    %131 = vector.load %arg2[%c1_86, %c0_87, %c0_88] : memref<2x4x256xf32, #tpu.memory_space<vmem>>, vector<1x4x256xf32>
    %132 = vector.shape_cast %131 : vector<1x4x256xf32> to vector<4x256xf32>
    %133 = arith.addf %130, %132 : vector<4x256xf32>
    %c1_89 = arith.constant 1 : index
    %c0_90 = arith.constant 0 : index
    %c0_91 = arith.constant 0 : index
    %134 = vector.load %arg7[%c1_89, %c0_90, %c0_91] : memref<2x4x256xf32, #tpu.memory_space<vmem>>, vector<1x4x256xf32>
    %135 = vector.shape_cast %134 : vector<1x4x256xf32> to vector<4x256xf32>
    %136 = vector.shape_cast %133 : vector<4x256xf32> to vector<1x4x256xf32>
    tpu.vector_store %arg7[%c1_89, %c0_90, %c0_91], %136 {strides = array<i32>} : memref<2x4x256xf32, #tpu.memory_space<vmem>>, vector<1x4x256xf32>,
    return
  }
  func.func @transform_0(%arg0: i32) -> (i32, i32, i32) {
    %c0_i32 = arith.constant 0 : i32
    %c0_i32_0 = arith.constant 0 : i32
    %c0_i32_1 = arith.constant 0 : i32
    return %arg0, %c0_i32, %c0_i32_0 : i32, i32, i32
  }
  func.func @transform_1(%arg0: i32) -> (i32, i32, i32) {
    %c0_i32 = arith.constant 0 : i32
    %c0_i32_0 = arith.constant 0 : i32
    %c0_i32_1 = arith.constant 0 : i32
    return %arg0, %c0_i32, %c0_i32_0 : i32, i32, i32
  }
  func.func @transform_2(%arg0: i32) -> (i32, i32) {
    %c0_i32 = arith.constant 0 : i32
    %c0_i32_0 = arith.constant 0 : i32
    %c0_i32_1 = arith.constant 0 : i32
    return %c0_i32, %c0_i32_0 : i32, i32
  }
  func.func @transform_3(%arg0: i32) -> (i32, i32) {
    %c0_i32 = arith.constant 0 : i32
    %c0_i32_0 = arith.constant 0 : i32
    %c0_i32_1 = arith.constant 0 : i32
    return %c0_i32, %c0_i32_0 : i32, i32
  }
  func.func @transform_4(%arg0: i32) -> (i32, i32) {
    %c0_i32 = arith.constant 0 : i32
    %c0_i32_0 = arith.constant 0 : i32
    %c0_i32_1 = arith.constant 0 : i32
    return %c0_i32, %c0_i32_0 : i32, i32
  }
  func.func @transform_5(%arg0: i32) -> (i32, i32) {
    %c0_i32 = arith.constant 0 : i32
    %c0_i32_0 = arith.constant 0 : i32
    %c0_i32_1 = arith.constant 0 : i32
    return %c0_i32, %c0_i32_0 : i32, i32
  }
  func.func @transform_6(%arg0: i32) -> (i32, i32, i32) {
    %c0_i32 = arith.constant 0 : i32
    %c0_i32_0 = arith.constant 0 : i32
    %c0_i32_1 = arith.constant 0 : i32
    return %arg0, %c0_i32, %c0_i32_0 : i32, i32, i32
  }
}

</mosaic_0001>

<bundles_post_ra>
// kernel: preact_residual_block.3
= control target key start
LH: loop header
LB: loop body
LE: loop exit
PB: predicated region body
PF: predicated region fallthrough
CT: control target
= control target key end

     0   :  { %6 = vsyncpa [#allocation3], 0  ;;  %s184_s0 = inlined_call_operand.hbm [shape: f32[2,4,256], index: 0, kind: input, shape index: {}]   ;;  %s185_s1 = inlined_call_operand.hbm [shape: f32[1,4,2], index: 1, kind: output, shape index: {}]  }
   0x1   :  { %7 = vsyncpa [#allocation4], 0  ;;  %s138_s6 = smov [#allocation2]   ;;  %s90_s10 = scalar_lea.hbm %s184_s0, 256 }
   0x2   :  { %s13_s7 = sshll.u32 %s138_s6, 4  ;;  %p91_p0 = scmp.ne.s32.totalorder %s184_s0, %s90_s10  ;;  %s14_s7 = int_to_ptr.vmem [resolvable:$true] %s13_s7 }
   0x3   :  { %p94_p1 = scmp.lt.u32.totalorder %s90_s10, %s184_s0 }
   0x5   :  { %p96_p2 = pnand %p94_p1, %p91_p0 }
   0x7   :  { %99 = shalt.err (!%p96_p2)
}
   0x8   :  { %s100_s15 = scalar_lea.vmem %s14_s7, 256  ;;  %p105_p4 = scmp.lt.s32.totalorder %s14_s7, %s14_s7 }
   0x9   :  { %p101_p3 = scmp.ne.s32.totalorder %s14_s7, %s100_s15  ;;  %p106_p5 = scmp.lt.s32.totalorder %s100_s15, %s100_s15 }
   0xb   :  { %p107_p6 = por %p106_p5, %p105_p4 }
   0xd   :  { %p108_p7 = pnand %p107_p6, %p101_p3 }
   0xf   :  { %111 = shalt.err (!%p108_p7)
}
  0x10   :  { %s139_s16 = smov 128   ;;  %s140_s17 = smov 8  }
  0x11   :  { %19 = dma.hbm_to_vmem [thread:$0]  %s184_s0, 256, %s14_s7, [#allocation3], %s139_s16, %s139_s16, %s140_s17  }
  0x12   :  { %134 = dma.done.wait [#allocation3], 256  }
  0x13   :  { %135 = vsyncadd [#allocation3], 4294967040  ;;  %vm27_vm0 = vcmask 1043456   ;;  %v45_v0 = vld [vmem:[#allocation2 + $0x8] sm:$0xff]  ;;  %v23_v1 = vld [vmem:[#allocation2] sm:$0xff]  ;;  %s141_s0 = smov [#allocation5]  }
  0x14   :  { %v47_v2 = vcombine.high %v45_v0, %v45_v0  ;;  %v49_v3 = vsel %vm27_vm0, %v45_v0, 0.0  ;;  %v25_v4 = vcombine.high %v23_v1, %v23_v1  ;;  %v28_v5 = vsel %vm27_vm0, %v23_v1, 0.0  ;;  %s75_s20 = sshll.u32 %s141_s0, 4  ;;  %s76_s20 = int_to_ptr.vmem [resolvable:$true] %s75_s20 }
  0x15   :  { %v55_v6 = vmul.f32 %v45_v0, %v45_v0  ;;  %v34_v7 = vmul.f32 %v23_v1, %v23_v1  ;;  %vm65_vm1 = vcmask 7168   ;;  %vm67_vm2 = vcmask 11264   ;;  %s112_s21 = scalar_lea.vmem %s76_s20, 64  ;;  %p117_p9 = scmp.lt.s32.totalorder %s76_s20, %s76_s20 }
  0x16   :  { %v50_v8 = vsel %vm27_vm0, %v47_v2, 0.0  ;;  %v29_v9 = vsel %vm27_vm0, %v25_v4, 0.0  ;;  %p113_p8 = scmp.ne.s32.totalorder %s76_s20, %s112_s21  ;;  %p118_p10 = scmp.lt.s32.totalorder %s112_s21, %s112_s21 }
  0x17   :  { %v51_v10 = vadd.f32 %v50_v8, %v49_v3  ;;  %v30_v11 = vadd.f32 %v29_v9, %v28_v5  ;;  %v57_v12 = vcombine.high %v55_v6, %v55_v6  ;;  %v59_v13 = vsel %vm27_vm0, %v55_v6, 0.0 }
  0x18   :  { %v36_v14 = vcombine.high %v34_v7, %v34_v7  ;;  %v38_v15 = vsel %vm27_vm0, %v34_v7, 0.0  ;;  %p119_p11 = por %p118_p10, %p117_p9 }
  0x19   :  { %52 = vadd.xlane.f32.xlu1 %v51_v10  ;;  %31 = vadd.xlane.f32.xlu0 %v30_v11  ;;  %v60_v16 = vsel %vm27_vm0, %v57_v12, 0.0 }
  0x1a   :  { %v61_v17 = vadd.f32 %v60_v16, %v59_v13  ;;  %v39_v18 = vsel %vm27_vm0, %v36_v14, 0.0  ;;  %p120_p12 = pnand %p119_p11, %p113_p8 }
  0x1b   :  { %v40_v19 = vadd.f32 %v39_v18, %v38_v15 }
  0x1d   :  { %62 = vadd.xlane.f32.xlu1 %v61_v17  ;;  %41 = vadd.xlane.f32.xlu0 %v40_v19 }
  0xa6   :  { %v53_v20 = vpop.xlane.xlu1 %52  ;;  %v32_v21 = vpop.xlane.xlu0 %31 }
  0xa7   :  { %v54_v24 = vadd.f32 %v53_v20, %v32_v21 }
  0xaa   :  { %v63_v22 = vpop.xlane.xlu1 %62  ;;  %v42_v23 = vpop.xlane.xlu0 %41 }
  0xab   :  { %v64_v25 = vadd.f32 %v63_v22, %v42_v23 }
  0xad   :  { %v66_v26 = vsel %vm65_vm1, %v54_v24, %v64_v25 }
  0xae   :  { %68 = vst.msk [vmem:[#allocation5] sm:$0xf] %vm67_vm2, %v66_v26 }
  0xaf   :  { %123 = shalt.err (!%p120_p12)
}
  0xb0   :  { %s124_s24 = scalar_lea.hbm %s185_s1, 64 }
  0xb1   :  { %p125_p13 = scmp.ne.s32.totalorder %s185_s1, %s124_s24  ;;  %p128_p0 = scmp.lt.u32.totalorder %s124_s24, %s185_s1 }
  0xb3   :  { %p130_p1 = pnand %p128_p0, %p125_p13 }
  0xb5   :  { %133 = shalt.err (!%p130_p1)
}
  0xb6   :  { %78 = dma.vmem_to_hbm [thread:$0]  %s76_s20, 64, %s185_s1, [#allocation4]  }
  0xb7   :  { %136 = dma.done.wait [#allocation4], 64  }
  0xb8   :  { %137 = vsyncadd [#allocation4], 4294967232 }
  0xb9   :  { %82 = vsyncpa [#allocation3], 1 }
  0xba   :  { %83 = vsyncpa [#allocation4], 1 }

// kernel: preact_residual_block.4
= control target key start
LH: loop header
LB: loop body
LE: loop exit
PB: predicated region body
PF: predicated region fallthrough
CT: control target
= control target key end

     0   :  { %12 = vsyncpa [#allocation4], 0  ;;  %s1448_s0 = inlined_call_operand.hbm [shape: f32[2,4,256], index: 0, kind: input, shape index: {}]   ;;  %s1449_s1 = inlined_call_operand.hbm [shape: f32[4,1], index: 1, kind: input, shape index: {}]   ;;  %s1450_s2 = inlined_call_operand.hbm [shape: f32[4,1], index: 2, kind: input, shape index: {}]   ;;  %s1451_s3 = inlined_call_operand.hbm [shape: bf16[4,36], index: 3, kind: input, shape index: {}]   ;;  %s1452_s4 = inlined_call_operand.hbm [shape: f32[9,256], index: 4, kind: input, shape index: {}]   ;;  %s1453_s5 = inlined_call_operand.hbm [shape: bf16[2,4,256], index: 5, kind: output, shape index: {0}]   ;;  %s1454_s6 = inlined_call_operand.hbm [shape: f32[1,4,2], index: 6, kind: output, shape index: {1}]  }
   0x1   :  { %13 = vsyncpa [#allocation7], 0 }
   0x2   :  { %14 = vsyncpa [#allocation10], 0 }
   0x3   :  { %15 = vsyncpa [#allocation5], 0 }
   0x4   :  { %16 = vsyncpa [#allocation14], 0  ;;  %s1147_s21 = smov [#allocation6]   ;;  %s1148_s23 = smov [#allocation9]  }
   0x5   :  { %s35_s22 = sshll.u32 %s1147_s21, 4  ;;  %s55_s24 = sshll.u32 %s1148_s23, 4  ;;  %s36_s22 = int_to_ptr.vmem [resolvable:$true] %s35_s22  ;;  %s56_s24 = int_to_ptr.vmem [resolvable:$true] %s55_s24 }
   0x6   :  { %s983_s27 = scalar_lea.hbm %s1449_s1, 64 }
   0x7   :  { %p984_p0 = scmp.ne.s32.totalorder %s1449_s1, %s983_s27  ;;  %p987_p1 = scmp.lt.u32.totalorder %s983_s27, %s1449_s1 }
   0x9   :  { %p989_p2 = pnand %p987_p1, %p984_p0 }
   0xb   :  { %992 = shalt.err (!%p989_p2)
}
   0xc   :  { %s993_s8 = scalar_lea.vmem %s36_s22, 64  ;;  %p998_p4 = scmp.lt.s32.totalorder %s36_s22, %s36_s22 }
   0xd   :  { %p994_p3 = scmp.ne.s32.totalorder %s36_s22, %s993_s8  ;;  %p999_p5 = scmp.lt.s32.totalorder %s993_s8, %s993_s8 }
   0xf   :  { %p1000_p6 = por %p999_p5, %p998_p4 }
  0x11   :  { %p1001_p7 = pnand %p1000_p6, %p994_p3 }
  0x13   :  { %1004 = shalt.err (!%p1001_p7)
}
  0x14   :  { %38 = dma.hbm_to_vmem [thread:$0]  %s1449_s1, 64, %s36_s22, [#allocation7]  }
  0x15   :  { %s1005_s13 = scalar_lea.hbm %s1451_s3, 32 }
  0x16   :  { %p1006_p8 = scmp.ne.s32.totalorder %s1451_s3, %s1005_s13  ;;  %p1009_p9 = scmp.lt.u32.totalorder %s1005_s13, %s1451_s3 }
  0x18   :  { %p1011_p10 = pnand %p1009_p9, %p1006_p8 }
  0x1a   :  { %1014 = shalt.err (!%p1011_p10)
}
  0x1b   :  { %s1015_s18 = scalar_lea.vmem %s56_s24, 32  ;;  %p1020_p12 = scmp.lt.s32.totalorder %s56_s24, %s56_s24 }
  0x1c   :  { %p1016_p11 = scmp.ne.s32.totalorder %s56_s24, %s1015_s18  ;;  %p1021_p13 = scmp.lt.s32.totalorder %s1015_s18, %s1015_s18 }
  0x1e   :  { %p1022_p0 = por %p1021_p13, %p1020_p12 }
  0x20   :  { %p1023_p1 = pnand %p1022_p0, %p1016_p11 }
  0x22   :  { %1026 = shalt.err (!%p1023_p1)
}
  0x23   :  { %58 = dma.hbm_to_vmem [thread:$0]  %s1451_s3, 32, %s56_s24, [#allocation10]  }
  0x24   :  { %s1149_s20 = smov [#allocation3]   ;;  %s1027_s25 = scalar_lea.hbm %s1448_s0, 256 }
  0x25   :  { %s22_s21 = sshll.u32 %s1149_s20, 4  ;;  %p1028_p2 = scmp.ne.s32.totalorder %s1448_s0, %s1027_s25  ;;  %s23_s21 = int_to_ptr.vmem [resolvable:$true] %s22_s21 }
  0x26   :  { %p1031_p3 = scmp.lt.u32.totalorder %s1027_s25, %s1448_s0 }
  0x28   :  { %p1033_p4 = pnand %p1031_p3, %p1028_p2 }
  0x2a   :  { %1036 = shalt.err (!%p1033_p4)
}
  0x2b   :  { %s1037_s30 = scalar_lea.vmem %s23_s21, 256  ;;  %p1042_p6 = scmp.lt.s32.totalorder %s23_s21, %s23_s21 }
  0x2c   :  { %p1038_p5 = scmp.ne.s32.totalorder %s23_s21, %s1037_s30  ;;  %p1043_p7 = scmp.lt.s32.totalorder %s1037_s30, %s1037_s30 }
  0x2e   :  { %p1044_p8 = por %p1043_p7, %p1042_p6 }
  0x30   :  { %p1045_p9 = pnand %p1044_p8, %p1038_p5 }
  0x32   :  { %1048 = shalt.err (!%p1045_p9)
}
  0x33   :  { %s1150_s3 = smov 128   ;;  %s1151_s24 = smov 8  }
  0x34   :  { %28 = dma.hbm_to_vmem [thread:$0]  %s1448_s0, 256, %s23_s21, [#allocation4], %s1150_s3, %s1150_s3, %s1151_s24  }
  0x35   :  { %s1152_s9 = smov [#allocation8]   ;;  %s1153_s11 = smov [#allocation11]  }
  0x36   :  { %s45_s10 = sshll.u32 %s1152_s9, 4  ;;  %s64_s12 = sshll.u32 %s1153_s11, 4  ;;  %s46_s10 = int_to_ptr.vmem [resolvable:$true] %s45_s10  ;;  %s65_s12 = int_to_ptr.vmem [resolvable:$true] %s64_s12 }
  0x37   :  { %s1049_s15 = scalar_lea.hbm %s1450_s2, 64 }
  0x38   :  { %p1050_p10 = scmp.ne.s32.totalorder %s1450_s2, %s1049_s15  ;;  %p1053_p11 = scmp.lt.u32.totalorder %s1049_s15, %s1450_s2 }
  0x3a   :  { %p1055_p12 = pnand %p1053_p11, %p1050_p10 }
  0x3c   :  { %1058 = shalt.err (!%p1055_p12)
}
  0x3d   :  { %s1059_s0 = scalar_lea.vmem %s46_s10, 64  ;;  %p1064_p0 = scmp.lt.s32.totalorder %s46_s10, %s46_s10 }
  0x3e   :  { %p1060_p13 = scmp.ne.s32.totalorder %s46_s10, %s1059_s0  ;;  %p1065_p1 = scmp.lt.s32.totalorder %s1059_s0, %s1059_s0 }
  0x40   :  { %p1066_p2 = por %p1065_p1, %p1064_p0 }
  0x42   :  { %p1067_p3 = pnand %p1066_p2, %p1060_p13 }
  0x44   :  { %1070 = shalt.err (!%p1067_p3)
}
  0x45   :  { %48 = dma.hbm_to_vmem [thread:$0]  %s1450_s2, 64, %s46_s10, [#allocation7]  }
  0x46   :  { %s1071_s23 = scalar_lea.hbm %s1452_s4, 512 }
  0x47   :  { %p1072_p4 = scmp.ne.s32.totalorder %s1452_s4, %s1071_s23  ;;  %p1075_p5 = scmp.lt.u32.totalorder %s1071_s23, %s1452_s4 }
  0x49   :  { %p1077_p6 = pnand %p1075_p5, %p1072_p4 }
  0x4b   :  { %1080 = shalt.err (!%p1077_p6)
}
  0x4c   :  { %s1081_s29 = scalar_lea.vmem %s65_s12, 512  ;;  %p1086_p8 = scmp.lt.s32.totalorder %s65_s12, %s65_s12 }
  0x4d   :  { %p1082_p7 = scmp.ne.s32.totalorder %s65_s12, %s1081_s29  ;;  %p1087_p9 = scmp.lt.s32.totalorder %s1081_s29, %s1081_s29 }
  0x4f   :  { %p1088_p10 = por %p1087_p9, %p1086_p8 }
  0x51   :  { %p1089_p11 = pnand %p1088_p10, %p1082_p7 }
  0x53   :  { %1092 = shalt.err (!%p1089_p11)
}
  0x54   :  { %s1154_s2 = smov 256   ;;  %s1155_s30 = smov 16  }
  0x55   :  { %70 = dma.hbm_to_vmem [thread:$0]  %s1452_s4, 512, %s65_s12, [#allocation10], %s1154_s2, %s1154_s2, %s1155_s30  }
  0x56   :  { %1137 = dma.done.wait [#allocation4], 256  }
  0x57   :  { %1138 = vsyncadd [#allocation4], 4294967040 }
  0x58   :  { %1139 = dma.done.wait [#allocation7], 128  }
  0x59   :  { %1140 = vsyncadd [#allocation7], 4294967168 }
  0x5a   :  { %1141 = dma.done.wait [#allocation10], 544  }
  0x5b   :  { %1142 = vsyncadd [#allocation10], 4294966752  ;;  %v1156_v0 = vmov 0   ;;  %v87_v1 = vld [vmem:[#allocation6] sm:$0xf]  ;;  %v98_v5 = vlaneseq  ;;  %v90_v11 = vld [vmem:[#allocation3] sm:$0xff] }
  0x5c   :  { %968 = vset.pattern.permute.xlu0 %v1156_v0  ;;  %456 = vmatprep.mubr.bf16.mxu0 %v1156_v0  ;;  %v88_v2 = vld [vmem:[#allocation8] sm:$0xf]  ;;  %v1157_v3 = vmov 839922192   ;;  %v495_v12 = vld [vmem:[#allocation3 + $0x8] sm:$0xff]  ;;  %s1158_s4 = smov 1  }
  0x5d   :  { %815 = vmatprep.mubr.bf16.mxu1 %v1156_v0  ;;  %93 = vperm.xlu0 %968, %v87_v1   ;;  %v96_v4 = vunpack.c.l.s4 %v1157_v3  ;;  %v99_v7 = vshrl.u32 %v98_v5, 7  ;;  %s1159_s7 = smov 17   ;;  %s1160_s8 = smov 15   ;;  %v1297_v25 = vand.u32 127, %v98_v5  ;;  %vm417_vm8 = vcmask 1041408  }
  0x5e   :  { %s1161_s9 = smov 127   ;;  %s1162_s10 = smov 112   ;;  %v161_v28 = vld [vmem:[#allocation11 + $0x1] ss:$8 sm:$0x3]  ;;  %vm413_vm9 = vcmask 293888  }
  0x5f   :  { %v97_v6 = vunpack.c.0.s8 %v96_v4  ;;  %s1163_s11 = smov 113   ;;  %s1164_s12 = smov 111   ;;  %v1299_v26 = vsub.s32 0, %v99_v7  ;;  %v1301_v27 = vsub.s32 1, %v99_v7  ;;  %vm157_vm0 = vcmp.lt.s32.totalorder %v1297_v25, 16 }
  0x60   :  { %v224_v33 = vld [vmem:[#allocation11 + $0x3] ss:$8 sm:$0x3]  ;;  %vm220_vm1 = vcmp.lt.s32.totalorder %v1297_v25, 1  ;;  %vm127_vm2 = vcmp.lt.s32.totalorder %v1297_v25, 17  ;;  %vm189_vm3 = vcmp.lt.s32.totalorder %v1297_v25, 15 }
  0x61   :  { %106 = vperm.xlu0 %968, %v88_v2   ;;  %v100_v8 = vsub.s32 %v97_v6, %v99_v7  ;;  %v166_v31 = vrot.slane %v161_v28, %v1299_v26  ;;  %v170_v32 = vrot.slane %v161_v28, %v1301_v27  ;;  %v229_v40 = vrot.slane %v224_v33, %v1299_v26  ;;  %v130_v42 = vld [vmem:[#allocation11] ss:$8 sm:$0x3]  ;;  %v193_v53 = vld [vmem:[#allocation11 + $0x2] ss:$8 sm:$0x3] }
  0x62   :  { %v233_v41 = vrot.slane %v224_v33, %v1301_v27  ;;  %v135_v48 = vrot.slane %v130_v42, %v1299_v26  ;;  %v139_v52 = vrot.slane %v130_v42, %v1301_v27  ;;  %v198_v59 = vrot.slane %v193_v53, %v1299_v26  ;;  %v265_v0 = vld [vmem:[#allocation11 + $0x5] ss:$8 sm:$0x3]  ;;  %s1165_s13 = smov [#allocation12]  }
  0x63   :  { %v202_v63 = vrot.slane %v193_v53, %v1301_v27  ;;  %vm261_vm4 = vcmp.lt.s32.totalorder %v1297_v25, 127  ;;  %vm324_vm5 = vcmp.lt.s32.totalorder %v1297_v25, 112  ;;  %vm293_vm6 = vcmp.lt.s32.totalorder %v1297_v25, 113  ;;  %s862_s14 = sshll.u32 %s1165_s13, 4  ;;  %s863_s14 = int_to_ptr.vmem [resolvable:$true] %s862_s14 }
  0x64   :  { %vm356_vm7 = vcmp.lt.s32.totalorder %v1297_v25, 111  ;;  %vm479_vm10 = vcmask 1043456   ;;  %s1093_s15 = scalar_lea.vmem %s863_s14, 128  ;;  %p1098_p13 = scmp.lt.s32.totalorder %s863_s14, %s863_s14 }
  0x65   :  { %p1094_p12 = scmp.ne.s32.totalorder %s863_s14, %s1093_s15  ;;  %p1099_p0 = scmp.lt.s32.totalorder %s1093_s15, %s1093_s15 }
  0x67   :  { %p1100_p1 = por %p1099_p0, %p1098_p13 }
  0x69   :  { %p1101_p2 = pnand %p1100_p1, %p1094_p12 }
  0xdc   :  { %v94_v9 = vpop.permute.xlu0 %93 }
  0xdd   :  { %v101_v10 = vrot.slane %v94_v9, %v100_v8  ;;  %v274_v9 = vrot.slane %v265_v0, %v1301_v27 }
  0xdf   :  { %v103_v14 = vmul.f32 %v101_v10, %v90_v11  ;;  %v496_v15 = vmul.f32 %v495_v12, %v101_v10  ;;  %v328_v10 = vld [vmem:[#allocation11 + $0x7] ss:$8 sm:$0x3] }
  0xe0   :  { %v107_v13 = vpop.permute.xlu0 %106 }
  0xe1   :  { %v114_v16 = vrot.slane %v107_v13, %v100_v8  ;;  %v270_v8 = vrot.slane %v265_v0, %v1299_v26 }
  0xe3   :  { %v116_v17 = vadd.f32 %v114_v16, %v103_v14  ;;  %v497_v18 = vadd.f32 %v496_v15, %v114_v16 }
  0xe5   :  { %v117_v19 = vmax.f32 %v116_v17, 0.0  ;;  %v1265_v20 = vmax.f32 %v497_v18, 0.0  ;;  %v333_v18 = vrot.slane %v328_v10, %v1299_v26 }
  0xe7   :  { %216 = vrot.lane.b32.xlu0 %v117_v19, %s1158_s4  ;;  %153 = vrot.lane.b32.xlu1 %v117_v19, %s1155_s30  ;;  %v119_v21 = vcombine.high %v117_v19, %v117_v19  ;;  %v1271_v22 = vcombine.high %v1265_v20, %v1265_v20 }
  0xe9   :  { %v932_v23 = vpack.c.bf16 %v119_v21, %v117_v19  ;;  %v941_v24 = vpack.c.bf16 %v1271_v22, %v1265_v20 }
  0xeb   :  { %121 = vrot.lane.b32.xlu0 %v117_v19, %s1159_s7  ;;  %155 = vrot.lane.b32.xlu1 %v119_v21, %s1155_s30  ;;  %256 = vst [vmem:[#allocation2 + $0x10] sm:$0x33] %v932_v23 }
  0xef   :  { %185 = vrot.lane.b32.xlu0 %v117_v19, %s1160_s8  ;;  %218 = vrot.lane.b32.xlu1 %v119_v21, %s1158_s4 }
  0xf3   :  { %257 = vrot.lane.b32.xlu0 %v117_v19, %s1161_s9  ;;  %123 = vrot.lane.b32.xlu1 %v119_v21, %s1159_s7 }
  0xf7   :  { %320 = vrot.lane.b32.xlu0 %v117_v19, %s1162_s10  ;;  %187 = vrot.lane.b32.xlu1 %v119_v21, %s1160_s8 }
  0xfb   :  { %289 = vrot.lane.b32.xlu0 %v117_v19, %s1163_s11  ;;  %259 = vrot.lane.b32.xlu1 %v119_v21, %s1161_s9 }
  0xff   :  { %531 = vrot.lane.b32.xlu0 %v1265_v20, %s1155_s30  ;;  %322 = vrot.lane.b32.xlu1 %v119_v21, %s1162_s10 }
 0x103   :  { %590 = vrot.lane.b32.xlu0 %v1265_v20, %s1158_s4  ;;  %291 = vrot.lane.b32.xlu1 %v119_v21, %s1163_s11 }
 0x107   :  { %352 = vrot.lane.b32.xlu0 %v117_v19, %s1164_s12  ;;  %533 = vrot.lane.b32.xlu1 %v1271_v22, %s1155_s30  ;;  %v337_v19 = vrot.slane %v328_v10, %v1301_v27 }
 0x10b   :  { %502 = vrot.lane.b32.xlu0 %v1265_v20, %s1159_s7  ;;  %592 = vrot.lane.b32.xlu1 %v1271_v22, %s1158_s4 }
 0x10f   :  { %561 = vrot.lane.b32.xlu0 %v1265_v20, %s1160_s8  ;;  %354 = vrot.lane.b32.xlu1 %v119_v21, %s1164_s12  ;;  %v297_v21 = vld [vmem:[#allocation11 + $0x6] ss:$8 sm:$0x3] }
 0x113   :  { %629 = vrot.lane.b32.xlu0 %v1265_v20, %s1161_s9  ;;  %504 = vrot.lane.b32.xlu1 %v1271_v22, %s1159_s7 }
 0x117   :  { %688 = vrot.lane.b32.xlu0 %v1265_v20, %s1162_s10  ;;  %563 = vrot.lane.b32.xlu1 %v1271_v22, %s1160_s8 }
 0x11b   :  { %659 = vrot.lane.b32.xlu0 %v1265_v20, %s1163_s11  ;;  %631 = vrot.lane.b32.xlu1 %v1271_v22, %s1161_s9 }
 0x11f   :  { %718 = vrot.lane.b32.xlu0 %v1265_v20, %s1164_s12  ;;  %690 = vrot.lane.b32.xlu1 %v1271_v22, %s1162_s10 }
 0x123   :  { %661 = vrot.lane.b32.xlu1 %v1271_v22, %s1163_s11 }
 0x127   :  { %720 = vrot.lane.b32.xlu1 %v1271_v22, %s1164_s12 }
 0x159   :  { %v217_v29 = vpop.permute.xlu0 %216  ;;  %v154_v30 = vpop.permute.xlu1 %153 }
 0x15d   :  { %v122_v34 = vpop.permute.xlu0 %121  ;;  %v156_v35 = vpop.permute.xlu1 %155 }
 0x15e   :  { %v158_v36 = vsel %vm157_vm0, %v154_v30, %v156_v35  ;;  %v159_v37 = vsel %vm157_vm0, %v156_v35, %v154_v30 }
 0x15f   :  { %v173_v38 = vmul.f32 %v166_v31, %v159_v37  ;;  %v174_v39 = vmul.f32 %v170_v32, %v158_v36  ;;  %v302_v32 = vrot.slane %v297_v21, %v1299_v26  ;;  %v306_v36 = vrot.slane %v297_v21, %v1301_v27  ;;  %v537_v37 = vld [vmem:[#allocation11 + $0x1] ss:$8 sm:$0x3] }
 0x161   :  { %v929_v43 = vpack.c.bf16 %v174_v39, %v173_v38  ;;  %v186_v44 = vpop.permute.xlu0 %185  ;;  %v219_v45 = vpop.permute.xlu1 %218 }
 0x162   :  { %v221_v46 = vsel %vm220_vm1, %v217_v29, %v219_v45  ;;  %v222_v47 = vsel %vm220_vm1, %v219_v45, %v217_v29 }
 0x163   :  { %v182_v49 = vrot.slane %v929_v43, 6  ;;  %v236_v50 = vmul.f32 %v229_v40, %v222_v47  ;;  %v237_v51 = vmul.f32 %v233_v41, %v221_v46  ;;  %v542_v46 = vrot.slane %v537_v37, %v1299_v26 }
 0x164   :  { %v546_v47 = vrot.slane %v537_v37, %v1301_v27 }
 0x165   :  { %184 = vst [vmem:[#allocation2] sm:$0xcc] %v182_v49  ;;  %v931_v54 = vpack.c.bf16 %v237_v51, %v236_v50  ;;  %v258_v55 = vpop.permute.xlu0 %257  ;;  %v124_v56 = vpop.permute.xlu1 %123 }
 0x166   :  { %v128_v57 = vsel %vm127_vm2, %v122_v34, %v124_v56  ;;  %v129_v58 = vsel %vm127_vm2, %v124_v56, %v122_v34 }
 0x167   :  { %v245_v60 = vrot.slane %v931_v54, 6  ;;  %v142_v61 = vmul.f32 %v135_v48, %v129_v58  ;;  %v143_v62 = vmul.f32 %v139_v52, %v128_v57  ;;  %v596_v52 = vld [vmem:[#allocation11 + $0x3] ss:$8 sm:$0x3] }
 0x169   :  { %247 = vst [vmem:[#allocation2 + $0x8] sm:$0xcc] %v245_v60  ;;  %v928_v1 = vpack.c.bf16 %v143_v62, %v142_v61  ;;  %v321_v2 = vpop.permute.xlu0 %320  ;;  %v188_v3 = vpop.permute.xlu1 %187  ;;  %v601_v60 = vrot.slane %v596_v52, %v1299_v26  ;;  %v605_v61 = vrot.slane %v596_v52, %v1301_v27  ;;  %v360_v62 = vld [vmem:[#allocation11 + $0x10] ss:$8 sm:$0x3] }
 0x16a   :  { %v190_v4 = vsel %vm189_vm3, %v186_v44, %v188_v3  ;;  %v191_v5 = vsel %vm189_vm3, %v188_v3, %v186_v44 }
 0x16b   :  { %152 = vst [vmem:[#allocation2] sm:$0x33] %v928_v1  ;;  %v205_v6 = vmul.f32 %v198_v59, %v191_v5  ;;  %v206_v7 = vmul.f32 %v202_v63, %v190_v4  ;;  %v365_v4 = vrot.slane %v360_v62, %v1299_v26 }
 0x16d   :  { %v930_v11 = vpack.c.bf16 %v206_v7, %v205_v6  ;;  %v290_v12 = vpop.permute.xlu0 %289  ;;  %v260_v13 = vpop.permute.xlu1 %259 }
 0x16e   :  { %v262_v14 = vsel %vm261_vm4, %v258_v55, %v260_v13  ;;  %v263_v15 = vsel %vm261_vm4, %v260_v13, %v258_v55 }
 0x16f   :  { %215 = vst [vmem:[#allocation2 + $0x8] sm:$0x33] %v930_v11  ;;  %v277_v16 = vmul.f32 %v270_v8, %v262_v14  ;;  %v278_v17 = vmul.f32 %v274_v9, %v263_v15  ;;  %v369_v8 = vrot.slane %v360_v62, %v1301_v27  ;;  %v508_v9 = vld [vmem:[#allocation11] ss:$8 sm:$0x3] }
 0x170   :  { %v513_v15 = vrot.slane %v508_v9, %v1299_v26 }
 0x171   :  { %v933_v23 = vpack.c.bf16 %v278_v17, %v277_v16  ;;  %v532_v28 = vpop.permute.xlu0 %531  ;;  %v323_v29 = vpop.permute.xlu1 %322  ;;  %v517_v16 = vrot.slane %v508_v9, %v1301_v27 }
 0x172   :  { %v325_v30 = vsel %vm324_vm5, %v321_v2, %v323_v29  ;;  %v326_v31 = vsel %vm324_vm5, %v323_v29, %v321_v2  ;;  %v383_v43 = vld [vmem:[#allocation2] sm:$0xff] }
 0x173   :  { %v286_v33 = vrot.slane %v933_v23, 6  ;;  %v340_v34 = vmul.f32 %v333_v18, %v325_v30  ;;  %v341_v35 = vmul.f32 %v337_v19, %v326_v31  ;;  %v567_v30 = vld [vmem:[#allocation11 + $0x2] ss:$8 sm:$0x3] }
 0x174   :  { %v572_v20 = vrot.slane %v567_v30, %v1299_v26  ;;  %v576_v22 = vrot.slane %v567_v30, %v1301_v27 }
 0x175   :  { %288 = vst [vmem:[#allocation2 + $0x10] sm:$0xcc] %v286_v33  ;;  %v935_v38 = vpack.c.bf16 %v341_v35, %v340_v34  ;;  %v591_v39 = vpop.permute.xlu0 %590  ;;  %v292_v40 = vpop.permute.xlu1 %291 }
 0x176   :  { %v294_v41 = vsel %vm293_vm6, %v290_v12, %v292_v40  ;;  %v295_v42 = vsel %vm293_vm6, %v292_v40, %v290_v12  ;;  %v384_v44 = vld [vmem:[#allocation2 + $0x8] sm:$0xff] }
 0x177   :  { %v969_v45 = vld [vmem:[#allocation2 + $0x4] ss:$8 sps:$4 sm:$0xff]   ;;  %v349_v48 = vrot.slane %v935_v38, 6  ;;  %v309_v49 = vmul.f32 %v302_v32, %v294_v41  ;;  %v310_v50 = vmul.f32 %v306_v36, %v295_v42  ;;  %v899_v51 = vcombine.low %v383_v43, %v384_v44 }
 0x178   :  { %424 = vmatprep.subr.bf16.mxu0 %v969_v45 }
 0x179   :  { %351 = vst [vmem:[#allocation2 + $0x18] sm:$0xcc] %v349_v48  ;;  %v934_v53 = vpack.c.bf16 %v310_v50, %v309_v49  ;;  %v353_v54 = vpop.permute.xlu0 %352  ;;  %v534_v55 = vpop.permute.xlu1 %533  ;;  %425 = vmatpush1.bf16.msra.mxu0 %v899_v51 }
 0x17a   :  { %v535_v56 = vsel %vm157_vm0, %v532_v28, %v534_v55  ;;  %v536_v57 = vsel %vm157_vm0, %v534_v55, %v532_v28 }
 0x17b   :  { %319 = vst [vmem:[#allocation2 + $0x18] sm:$0x33] %v934_v53  ;;  %v549_v58 = vmul.f32 %v542_v46, %v536_v57  ;;  %v550_v59 = vmul.f32 %v546_v47, %v535_v56  ;;  %v694_v46 = vld [vmem:[#allocation11 + $0x7] ss:$8 sm:$0x3] }
 0x17c   :  { %v385_v17 = vld [vmem:[#allocation2 + $0x10] sm:$0xff]  ;;  %v699_v52 = vrot.slane %v694_v46, %v1299_v26  ;;  %v703_v53 = vrot.slane %v694_v46, %v1301_v27 }
 0x17d   :  { %v938_v63 = vpack.c.bf16 %v550_v59, %v549_v58  ;;  %v503_v0 = vpop.permute.xlu0 %502  ;;  %v593_v1 = vpop.permute.xlu1 %592  ;;  %v665_v59 = vld [vmem:[#allocation11 + $0x6] ss:$8 sm:$0x3] }
 0x17e   :  { %v594_v2 = vsel %vm220_vm1, %v591_v39, %v593_v1  ;;  %v595_v3 = vsel %vm220_vm1, %v593_v1, %v591_v39  ;;  %v670_v1 = vrot.slane %v665_v59, %v1299_v26 }
 0x17f   :  { %v558_v5 = vrot.slane %v938_v63, 6  ;;  %v608_v6 = vmul.f32 %v601_v60, %v595_v3  ;;  %v609_v7 = vmul.f32 %v605_v61, %v594_v2  ;;  %v89_v2 = vld [vmem:[#allocation9] sm:$0x3] }
 0x181   :  { %560 = vst [vmem:[#allocation2] sm:$0xcc] %v558_v5  ;;  %v940_v10 = vpack.c.bf16 %v609_v7, %v608_v6  ;;  %v562_v11 = vpop.permute.xlu0 %561  ;;  %v355_v12 = vpop.permute.xlu1 %354  ;;  %v674_v7 = vrot.slane %v665_v59, %v1301_v27 }
 0x182   :  { %v357_v13 = vsel %vm356_vm7, %v353_v54, %v355_v12  ;;  %v358_v14 = vsel %vm356_vm7, %v355_v12, %v353_v54  ;;  %v386_v18 = vld [vmem:[#allocation2 + $0x18] sm:$0xff] }
 0x183   :  { %v971_v19 = vld [vmem:[#allocation2 + $0x14] ss:$8 sps:$4 sm:$0xff]   ;;  %v617_v21 = vrot.slane %v940_v10, 6  ;;  %v372_v23 = vmul.f32 %v365_v4, %v357_v13  ;;  %v373_v28 = vmul.f32 %v369_v8, %v358_v14  ;;  %v901_v29 = vcombine.low %v385_v17, %v386_v18  ;;  %v724_v8 = vld [vmem:[#allocation11 + $0x10] ss:$8 sm:$0x3] }
 0x184   :  { %628 = vst [vmem:[#allocation2 + $0x10] sm:$0x33] %v941_v24  ;;  %426 = vmatprep.subr.bf16.mxu0 %v971_v19  ;;  %v635_v24 = vld [vmem:[#allocation11 + $0x5] ss:$8 sm:$0x3]  ;;  %v729_v14 = vrot.slane %v724_v8, %v1299_v26  ;;  %v733_v19 = vrot.slane %v724_v8, %v1301_v27 }
 0x185   :  { %619 = vst [vmem:[#allocation2 + $0x8] sm:$0xcc] %v617_v21  ;;  %v936_v31 = vpack.c.bf16 %v373_v28, %v372_v23  ;;  %v505_v32 = vpop.permute.xlu1 %504  ;;  %427 = vmatpush1.bf16.msra.mxu0 %v901_v29  ;;  %v630_v35 = vpop.permute.xlu0 %629  ;;  %v640_v44 = vrot.slane %v635_v24, %v1299_v26  ;;  %v644_v45 = vrot.slane %v635_v24, %v1301_v27 }
 0x186   :  { %v506_v33 = vsel %vm127_vm2, %v503_v0, %v505_v32  ;;  %v507_v34 = vsel %vm127_vm2, %v505_v32, %v503_v0 }
 0x187   :  { %382 = vst [vmem:[#allocation2 + $0x20] sm:$0x33] %v936_v31  ;;  %v520_v36 = vmul.f32 %v513_v15, %v507_v34  ;;  %v521_v37 = vmul.f32 %v517_v16, %v506_v33 }
 0x189   :  { %v937_v38 = vpack.c.bf16 %v521_v37, %v520_v36  ;;  %v564_v39 = vpop.permute.xlu1 %563  ;;  %v689_v47 = vpop.permute.xlu0 %688 }
 0x18a   :  { %v565_v40 = vsel %vm189_vm3, %v562_v11, %v564_v39  ;;  %v566_v41 = vsel %vm189_vm3, %v564_v39, %v562_v11 }
 0x18b   :  { %530 = vst [vmem:[#allocation2] sm:$0x33] %v937_v38  ;;  %v579_v42 = vmul.f32 %v572_v20, %v566_v41  ;;  %v580_v43 = vmul.f32 %v576_v22, %v565_v40 }
 0x18d   :  { %v939_v48 = vpack.c.bf16 %v580_v43, %v579_v42  ;;  %v632_v49 = vpop.permute.xlu1 %631  ;;  %v660_v3 = vpop.permute.xlu0 %659 }
 0x18e   :  { %v633_v50 = vsel %vm261_vm4, %v630_v35, %v632_v49  ;;  %v634_v51 = vsel %vm261_vm4, %v632_v49, %v630_v35  ;;  %v387_v54 = vld [vmem:[#allocation2 + $0x20] sm:$0x33] }
 0x18f   :  { %589 = vst [vmem:[#allocation2 + $0x8] sm:$0x33] %v939_v48  ;;  %v647_v55 = vmul.f32 %v640_v44, %v633_v50  ;;  %v648_v56 = vmul.f32 %v644_v45, %v634_v51  ;;  %v904_v57 = vcombine.high %v387_v54, %v387_v54  ;;  %v903_v58 = vcombine.low %v387_v54, %v387_v54 }
 0x191   :  { %v942_v60 = vpack.c.bf16 %v648_v56, %v647_v55  ;;  %v691_v61 = vpop.permute.xlu1 %690  ;;  %905 = vmatprep.subr.msk.bf16.mxu0 %vm417_vm8, %v904_v57  ;;  %v419_v62 = vsel %vm417_vm8, %v903_v58, 0  ;;  %v719_v21 = vpop.permute.xlu0 %718 }
 0x192   :  { %v692_v63 = vsel %vm324_vm5, %v689_v47, %v691_v61  ;;  %v693_v0 = vsel %vm324_vm5, %v691_v61, %v689_v47  ;;  %429 = vmatpush1.bf16.msra.mxu0 %v419_v62 }
 0x193   :  { %v656_v4 = vrot.slane %v942_v60, 6  ;;  %v706_v5 = vmul.f32 %v699_v52, %v692_v63  ;;  %v707_v6 = vmul.f32 %v703_v53, %v693_v0 }
 0x195   :  { %658 = vst [vmem:[#allocation2 + $0x10] sm:$0xcc] %v656_v4  ;;  %v944_v9 = vpack.c.bf16 %v707_v6, %v706_v5  ;;  %v662_v10 = vpop.permute.xlu1 %661  ;;  %906 = vmatmul.mubr.msk.bf16.vlgmr.msra.gmra.mrb[0].mxu0 %vm413_vm9, %v89_v2 }
 0x196   :  { %v663_v11 = vsel %vm293_vm6, %v660_v3, %v662_v10  ;;  %v664_v12 = vsel %vm293_vm6, %v662_v10, %v660_v3  ;;  %v975_v13 = vld [vmem:[#allocation2 + $0x4] ss:$8 sps:$4 sm:$0xff]   ;;  %v977_v15 = vld [vmem:[#allocation2] ss:$8 sps:$4 sm:$0xff]  }
 0x197   :  { %v715_v16 = vrot.slane %v944_v9, 6  ;;  %v677_v17 = vmul.f32 %v670_v1, %v663_v11  ;;  %v678_v18 = vmul.f32 %v674_v7, %v664_v12  ;;  %783 = vmatprep.subr.bf16.mxu1 %v975_v13 }
 0x198   :  { %784 = vmatpush1.bf16.msra.mxu1 %v977_v15 }
 0x199   :  { %717 = vst [vmem:[#allocation2 + $0x18] sm:$0xcc] %v715_v16  ;;  %v943_v23 = vpack.c.bf16 %v678_v18, %v677_v17  ;;  %v721_v28 = vpop.permute.xlu1 %720 }
 0x19a   :  { %v722_v29 = vsel %vm356_vm7, %v719_v21, %v721_v28  ;;  %v723_v30 = vsel %vm356_vm7, %v721_v28, %v719_v21 }
 0x19b   :  { %687 = vst [vmem:[#allocation2 + $0x18] sm:$0x33] %v943_v23  ;;  %v736_v26 = vmul.f32 %v729_v14, %v722_v29  ;;  %v737_v31 = vmul.f32 %v733_v19, %v723_v30 }
 0x19d   :  { %v945_v32 = vpack.c.bf16 %v737_v31, %v736_v26 }
 0x19f   :  { %746 = vst [vmem:[#allocation2 + $0x20] sm:$0x33] %v945_v32 }
 0x1a2   :  { %v978_v33 = vld [vmem:[#allocation2 + $0x14] ss:$8 sps:$4 sm:$0xff]   ;;  %v980_v34 = vld [vmem:[#allocation2 + $0x10] ss:$8 sps:$4 sm:$0xff]  }
 0x1a3   :  { %785 = vmatprep.subr.bf16.mxu1 %v978_v33 }
 0x1a4   :  { %786 = vmatpush1.bf16.msra.mxu1 %v980_v34 }
 0x1a6   :  { %v751_v27 = vld [vmem:[#allocation2 + $0x20] sm:$0x33] }
 0x1a7   :  { %v923_v35 = vcombine.high %v751_v27, %v751_v27  ;;  %v922_v36 = vcombine.low %v751_v27, %v751_v27 }
 0x1a9   :  { %924 = vmatprep.subr.msk.bf16.mxu1 %vm417_vm8, %v923_v35  ;;  %v778_v37 = vsel %vm417_vm8, %v922_v36, 0 }
 0x1aa   :  { %788 = vmatpush1.bf16.msra.mxu1 %v778_v37 }
 0x1ad   :  { %925 = vmatmul.mubr.msk.bf16.vlgmr.msra.gmra.mrb[0].mxu1 %vm413_vm9, %v89_v2 }
 0x268   :  { %v458_v25 = vpop.f32.mrb[0].mxu0 }
 0x269   :  { %v486_v20 = vmul.f32 %v458_v25, %v458_v25  ;;  %v460_v22 = vpop.f32.mrb[1].mxu0  ;;  %v480_v24 = vsel %vm479_vm10, %v458_v25, 0.0 }
 0x26a   :  { %v907_v38 = vpack.c.bf16 %v460_v22, %v458_v25  ;;  %v487_v39 = vmul.f32 %v460_v22, %v460_v22  ;;  %v462_v40 = vpop.f32.mrb[2].mxu0  ;;  %v481_v41 = vsel %vm479_vm10, %v460_v22, 0.0 }
 0x26b   :  { %v463_v42 = vpop.f32.mrb[3].mxu0  ;;  %v482_v43 = vadd.f32 %v481_v41, %v480_v24  ;;  %v488_v44 = vsel %vm479_vm10, %v486_v20, 0.0 }
 0x26c   :  { %908 = vst.sshfl [vmem:[#allocation12] sm:$0x33 pattern:$0x76325410] %v907_v38  ;;  %v489_v45 = vsel %vm479_vm10, %v487_v39, 0.0 }
 0x26d   :  { %483 = vadd.xlane.f32.xlu0 %v482_v43  ;;  %v490_v46 = vadd.f32 %v489_v45, %v488_v44 }
 0x26f   :  { %491 = vadd.xlane.f32.xlu1 %v490_v46 }
 0x280   :  { %v817_v47 = vpop.f32.mrb[0].mxu1 }
 0x281   :  { %v845_v48 = vmul.f32 %v817_v47, %v817_v47  ;;  %v819_v49 = vpop.f32.mrb[1].mxu1  ;;  %v839_v50 = vsel %vm479_vm10, %v817_v47, 0.0 }
 0x282   :  { %v926_v51 = vpack.c.bf16 %v819_v49, %v817_v47  ;;  %v846_v52 = vmul.f32 %v819_v49, %v819_v49  ;;  %v821_v53 = vpop.f32.mrb[2].mxu1  ;;  %v840_v54 = vsel %vm479_vm10, %v819_v49, 0.0 }
 0x283   :  { %v822_v55 = vpop.f32.mrb[3].mxu1  ;;  %v841_v56 = vadd.f32 %v840_v54, %v839_v50  ;;  %v847_v57 = vsel %vm479_vm10, %v845_v48, 0.0 }
 0x284   :  { %927 = vst.sshfl [vmem:[#allocation12 + $0x4] sm:$0x33 pattern:$0x76325410] %v926_v51  ;;  %v848_v58 = vsel %vm479_vm10, %v846_v52, 0.0 }
 0x285   :  { %842 = vadd.xlane.f32.xlu0 %v841_v56  ;;  %v849_v59 = vadd.f32 %v848_v58, %v847_v57 }
 0x289   :  { %850 = vadd.xlane.f32.xlu0 %v849_v59 }
 0x28a   :  { %1104 = shalt.err (!%p1101_p2)
}
 0x28b   :  { %s1105_s18 = scalar_lea.hbm %s1453_s5, 128 }
 0x28c   :  { %p1106_p3 = scmp.ne.s32.totalorder %s1453_s5, %s1105_s18  ;;  %p1109_p4 = scmp.lt.u32.totalorder %s1105_s18, %s1453_s5 }
 0x28e   :  { %p1111_p5 = pnand %p1109_p4, %p1106_p3 }
 0x290   :  { %1114 = shalt.err (!%p1111_p5)
}
 0x291   :  { %s1166_s21 = smov 64   ;;  %s1167_s22 = smov 4   ;;  %vm853_vm11 = vcmask 7168   ;;  %vm855_vm12 = vcmask 11264  }
 0x292   :  { %868 = dma.vmem_to_hbm [thread:$0]  %s863_s14, 128, %s1453_s5, [#allocation5], %s1166_s21, %s1166_s21, %s1167_s22  }
 0x293   :  { %s1168_s26 = smov [#allocation13]  }
 0x294   :  { %s875_s27 = sshll.u32 %s1168_s26, 4  ;;  %s876_s27 = int_to_ptr.vmem [resolvable:$true] %s875_s27 }
 0x295   :  { %s1115_s28 = scalar_lea.vmem %s876_s27, 64  ;;  %p1120_p7 = scmp.lt.s32.totalorder %s876_s27, %s876_s27 }
 0x296   :  { %p1116_p6 = scmp.ne.s32.totalorder %s876_s27, %s1115_s28  ;;  %p1121_p8 = scmp.lt.s32.totalorder %s1115_s28, %s1115_s28 }
 0x298   :  { %p1122_p9 = por %p1121_p8, %p1120_p7 }
 0x29a   :  { %p1123_p10 = pnand %p1122_p9, %p1116_p6 }
 0x2fa   :  { %v484_v60 = vpop.xlane.xlu0 %483 }
 0x2fc   :  { %v492_v62 = vpop.xlane.xlu1 %491 }
 0x312   :  { %v843_v61 = vpop.xlane.xlu0 %842 }
 0x313   :  { %v844_v0 = vadd.f32 %v843_v61, %v484_v60 }
 0x316   :  { %v851_v63 = vpop.xlane.xlu0 %850 }
 0x317   :  { %v852_v1 = vadd.f32 %v851_v63, %v492_v62 }
 0x319   :  { %v854_v2 = vsel %vm853_vm11, %v844_v0, %v852_v1 }
 0x31a   :  { %856 = vst.msk [vmem:[#allocation13] sm:$0xf] %vm855_vm12, %v854_v2 }
 0x31b   :  { %1126 = shalt.err (!%p1123_p10)
}
 0x31c   :  { %s1127_s2 = scalar_lea.hbm %s1454_s6, 64 }
 0x31d   :  { %p1128_p11 = scmp.ne.s32.totalorder %s1454_s6, %s1127_s2  ;;  %p1131_p12 = scmp.lt.u32.totalorder %s1127_s2, %s1454_s6 }
 0x31f   :  { %p1133_p13 = pnand %p1131_p12, %p1128_p11 }
 0x321   :  { %1136 = shalt.err (!%p1133_p13)
}
 0x322   :  { %878 = dma.vmem_to_hbm [thread:$0]  %s876_s27, 64, %s1454_s6, [#allocation14]  }
 0x323   :  { %1143 = dma.done.wait [#allocation5], 128  }
 0x324   :  { %1144 = vsyncadd [#allocation5], 4294967168 }
 0x325   :  { %1145 = dma.done.wait [#allocation14], 64  }
 0x326   :  { %1146 = vsyncadd [#allocation14], 4294967232 }
 0x327   :  { %885 = vsyncpa [#allocation4], 1 }
 0x328   :  { %886 = vsyncpa [#allocation7], 1 }
 0x329   :  { %887 = vsyncpa [#allocation10], 1 }
 0x32a   :  { %888 = vsyncpa [#allocation5], 1 }
 0x32b   :  { %889 = vsyncpa [#allocation14], 1 }

// kernel: preact_residual_block.5
= control target key start
LH: loop header
LB: loop body
LE: loop exit
PB: predicated region body
PF: predicated region fallthrough
CT: control target
= control target key end

     0   :  { %11 = vsyncpa [#allocation4], 0  ;;  %s1405_s0 = inlined_call_operand.hbm [shape: bf16[2,4,256], index: 0, kind: input, shape index: {}]   ;;  %s1406_s1 = inlined_call_operand.hbm [shape: f32[2,4,256], index: 1, kind: input, shape index: {}]   ;;  %s1407_s2 = inlined_call_operand.hbm [shape: f32[4,1], index: 2, kind: input, shape index: {}]   ;;  %s1408_s3 = inlined_call_operand.hbm [shape: f32[4,1], index: 3, kind: input, shape index: {}]   ;;  %s1409_s4 = inlined_call_operand.hbm [shape: bf16[4,36], index: 4, kind: input, shape index: {}]   ;;  %s1410_s5 = inlined_call_operand.hbm [shape: f32[9,256], index: 5, kind: input, shape index: {}]   ;;  %s1411_s6 = inlined_call_operand.hbm [shape: f32[2,4,256], index: 6, kind: output, shape index: {}]  }
   0x1   :  { %12 = vsyncpa [#allocation7], 0 }
   0x2   :  { %13 = vsyncpa [#allocation10], 0 }
   0x3   :  { %14 = vsyncpa [#allocation13], 0 }
   0x4   :  { %15 = vsyncpa [#allocation5], 0  ;;  %s1106_s21 = smov [#allocation6]   ;;  %s942_s25 = scalar_lea.hbm %s1406_s1, 256 }
   0x5   :  { %s33_s22 = sshll.u32 %s1106_s21, 4  ;;  %p943_p0 = scmp.ne.s32.totalorder %s1406_s1, %s942_s25  ;;  %s34_s22 = int_to_ptr.vmem [resolvable:$true] %s33_s22 }
   0x6   :  { %p946_p1 = scmp.lt.u32.totalorder %s942_s25, %s1406_s1 }
   0x8   :  { %p948_p2 = pnand %p946_p1, %p943_p0 }
   0xa   :  { %951 = shalt.err (!%p948_p2)
}
   0xb   :  { %s952_s30 = scalar_lea.vmem %s34_s22, 256  ;;  %p957_p4 = scmp.lt.s32.totalorder %s34_s22, %s34_s22 }
   0xc   :  { %p953_p3 = scmp.ne.s32.totalorder %s34_s22, %s952_s30  ;;  %p958_p5 = scmp.lt.s32.totalorder %s952_s30, %s952_s30 }
   0xe   :  { %p959_p6 = por %p958_p5, %p957_p4 }
  0x10   :  { %p960_p7 = pnand %p959_p6, %p953_p3 }
  0x12   :  { %963 = shalt.err (!%p960_p7)
}
  0x13   :  { %s1107_s7 = smov 128   ;;  %s1108_s8 = smov 8  }
  0x14   :  { %39 = dma.hbm_to_vmem [thread:$0]  %s1406_s1, 256, %s34_s22, [#allocation7], %s1107_s7, %s1107_s7, %s1108_s8  }
  0x15   :  { %s1109_s11 = smov [#allocation9]   ;;  %s1110_s13 = smov [#allocation3]  }
  0x16   :  { %s56_s12 = sshll.u32 %s1109_s11, 4  ;;  %s21_s14 = sshll.u32 %s1110_s13, 4  ;;  %s57_s12 = int_to_ptr.vmem [resolvable:$true] %s56_s12  ;;  %s22_s14 = int_to_ptr.vmem [resolvable:$true] %s21_s14 }
  0x17   :  { %s964_s17 = scalar_lea.hbm %s1408_s3, 64 }
  0x18   :  { %p965_p8 = scmp.ne.s32.totalorder %s1408_s3, %s964_s17  ;;  %p968_p9 = scmp.lt.u32.totalorder %s964_s17, %s1408_s3 }
  0x1a   :  { %p970_p10 = pnand %p968_p9, %p965_p8 }
  0x1c   :  { %973 = shalt.err (!%p970_p10)
}
  0x1d   :  { %s974_s1 = scalar_lea.vmem %s57_s12, 64  ;;  %p979_p12 = scmp.lt.s32.totalorder %s57_s12, %s57_s12 }
  0x1e   :  { %p975_p11 = scmp.ne.s32.totalorder %s57_s12, %s974_s1  ;;  %p980_p13 = scmp.lt.s32.totalorder %s974_s1, %s974_s1 }
  0x20   :  { %p981_p0 = por %p980_p13, %p979_p12 }
  0x22   :  { %p982_p1 = pnand %p981_p0, %p975_p11 }
  0x24   :  { %985 = shalt.err (!%p982_p1)
}
  0x25   :  { %59 = dma.hbm_to_vmem [thread:$0]  %s1408_s3, 64, %s57_s12, [#allocation10]  }
  0x26   :  { %s986_s26 = scalar_lea.hbm %s1405_s0, 128 }
  0x27   :  { %p987_p2 = scmp.ne.s32.totalorder %s1405_s0, %s986_s26  ;;  %p990_p3 = scmp.lt.u32.totalorder %s986_s26, %s1405_s0 }
  0x29   :  { %p992_p4 = pnand %p990_p3, %p987_p2 }
  0x2b   :  { %995 = shalt.err (!%p992_p4)
}
  0x2c   :  { %s996_s9 = scalar_lea.vmem %s22_s14, 128  ;;  %p1001_p6 = scmp.lt.s32.totalorder %s22_s14, %s22_s14 }
  0x2d   :  { %p997_p5 = scmp.ne.s32.totalorder %s22_s14, %s996_s9  ;;  %p1002_p7 = scmp.lt.s32.totalorder %s996_s9, %s996_s9 }
  0x2f   :  { %p1003_p8 = por %p1002_p7, %p1001_p6 }
  0x31   :  { %p1004_p9 = pnand %p1003_p8, %p997_p5 }
  0x33   :  { %1007 = shalt.err (!%p1004_p9)
}
  0x34   :  { %s1111_s3 = smov 64   ;;  %s1112_s10 = smov 4  }
  0x35   :  { %27 = dma.hbm_to_vmem [thread:$0]  %s1405_s0, 128, %s22_s14, [#allocation4], %s1111_s3, %s1111_s3, %s1112_s10  }
  0x36   :  { %s1113_s13 = smov [#allocation8]   ;;  %s1114_s16 = smov [#allocation11]  }
  0x37   :  { %s46_s15 = sshll.u32 %s1113_s13, 4  ;;  %s66_s17 = sshll.u32 %s1114_s16, 4  ;;  %s47_s15 = int_to_ptr.vmem [resolvable:$true] %s46_s15  ;;  %s67_s17 = int_to_ptr.vmem [resolvable:$true] %s66_s17 }
  0x38   :  { %s1008_s20 = scalar_lea.hbm %s1407_s2, 64 }
  0x39   :  { %p1009_p10 = scmp.ne.s32.totalorder %s1407_s2, %s1008_s20  ;;  %p1012_p11 = scmp.lt.u32.totalorder %s1008_s20, %s1407_s2 }
  0x3b   :  { %p1014_p12 = pnand %p1012_p11, %p1009_p10 }
  0x3d   :  { %1017 = shalt.err (!%p1014_p12)
}
  0x3e   :  { %s1018_s0 = scalar_lea.vmem %s47_s15, 64  ;;  %p1023_p0 = scmp.lt.s32.totalorder %s47_s15, %s47_s15 }
  0x3f   :  { %p1019_p13 = scmp.ne.s32.totalorder %s47_s15, %s1018_s0  ;;  %p1024_p1 = scmp.lt.s32.totalorder %s1018_s0, %s1018_s0 }
  0x41   :  { %p1025_p2 = por %p1024_p1, %p1023_p0 }
  0x43   :  { %p1026_p3 = pnand %p1025_p2, %p1019_p13 }
  0x45   :  { %1029 = shalt.err (!%p1026_p3)
}
  0x46   :  { %49 = dma.hbm_to_vmem [thread:$0]  %s1407_s2, 64, %s47_s15, [#allocation7]  }
  0x47   :  { %s1030_s27 = scalar_lea.hbm %s1409_s4, 32 }
  0x48   :  { %p1031_p4 = scmp.ne.s32.totalorder %s1409_s4, %s1030_s27  ;;  %p1034_p5 = scmp.lt.u32.totalorder %s1030_s27, %s1409_s4 }
  0x4a   :  { %p1036_p6 = pnand %p1034_p5, %p1031_p4 }
  0x4c   :  { %1039 = shalt.err (!%p1036_p6)
}
  0x4d   :  { %s1040_s3 = scalar_lea.vmem %s67_s17, 32  ;;  %p1045_p8 = scmp.lt.s32.totalorder %s67_s17, %s67_s17 }
  0x4e   :  { %p1041_p7 = scmp.ne.s32.totalorder %s67_s17, %s1040_s3  ;;  %p1046_p9 = scmp.lt.s32.totalorder %s1040_s3, %s1040_s3 }
  0x50   :  { %p1047_p10 = por %p1046_p9, %p1045_p8 }
  0x52   :  { %p1048_p11 = pnand %p1047_p10, %p1041_p7 }
  0x54   :  { %1051 = shalt.err (!%p1048_p11)
}
  0x55   :  { %69 = dma.hbm_to_vmem [thread:$0]  %s1409_s4, 32, %s67_s17, [#allocation10]  }
  0x56   :  { %s1115_s11 = smov [#allocation12]   ;;  %s1052_s16 = scalar_lea.hbm %s1410_s5, 512 }
  0x57   :  { %s75_s12 = sshll.u32 %s1115_s11, 4  ;;  %p1053_p12 = scmp.ne.s32.totalorder %s1410_s5, %s1052_s16  ;;  %s76_s12 = int_to_ptr.vmem [resolvable:$true] %s75_s12 }
  0x58   :  { %p1056_p13 = scmp.lt.u32.totalorder %s1052_s16, %s1410_s5 }
  0x5a   :  { %p1058_p0 = pnand %p1056_p13, %p1053_p12 }
  0x5c   :  { %1061 = shalt.err (!%p1058_p0)
}
  0x5d   :  { %s1062_s1 = scalar_lea.vmem %s76_s12, 512  ;;  %p1067_p2 = scmp.lt.s32.totalorder %s76_s12, %s76_s12 }
  0x5e   :  { %p1063_p1 = scmp.ne.s32.totalorder %s76_s12, %s1062_s1  ;;  %p1068_p3 = scmp.lt.s32.totalorder %s1062_s1, %s1062_s1 }
  0x60   :  { %p1069_p4 = por %p1068_p3, %p1067_p2 }
  0x62   :  { %p1070_p5 = pnand %p1069_p4, %p1063_p1 }
  0x64   :  { %1073 = shalt.err (!%p1070_p5)
}
  0x65   :  { %s1116_s4 = smov 256   ;;  %s1117_s17 = smov 16  }
  0x66   :  { %81 = dma.hbm_to_vmem [thread:$0]  %s1410_s5, 512, %s76_s12, [#allocation13], %s1116_s4, %s1116_s4, %s1117_s17  }
  0x67   :  { %1096 = dma.done.wait [#allocation4], 128  }
  0x68   :  { %1097 = vsyncadd [#allocation4], 4294967168 }
  0x69   :  { %1098 = dma.done.wait [#allocation7], 320  }
  0x6a   :  { %1099 = vsyncadd [#allocation7], 4294966976 }
  0x6b   :  { %1100 = dma.done.wait [#allocation10], 96  }
  0x6c   :  { %1101 = vsyncadd [#allocation10], 4294967200 }
  0x6d   :  { %1102 = dma.done.wait [#allocation13], 512  }
  0x6e   :  { %1103 = vsyncadd [#allocation13], 4294966784  ;;  %v1118_v0 = vmov 0   ;;  %v101_v1 = vld [vmem:[#allocation8] sm:$0xf]  ;;  %v113_v5 = vlaneseq  ;;  %v104_v9 = vld [vmem:[#allocation3] sm:$0xff]  }
  0x6f   :  { %925 = vset.pattern.permute.xlu0 %v1118_v0  ;;  %475 = vmatprep.mubr.bf16.mxu0 %v1118_v0  ;;  %v102_v2 = vld [vmem:[#allocation9] sm:$0xf]  ;;  %v1119_v3 = vmov 839922192   ;;  %v105_v11 = vunpack.c.l.bf16 %v104_v9  ;;  %v491_v12 = vunpack.c.h.bf16 %v104_v9  ;;  %s1120_s5 = smov 1   ;;  %s1121_s0 = smov 17  }
  0x70   :  { %816 = vmatprep.mubr.bf16.mxu1 %v1118_v0  ;;  %108 = vperm.xlu0 %925, %v101_v1   ;;  %v111_v4 = vunpack.c.l.s4 %v1119_v3  ;;  %v114_v7 = vshrl.u32 %v113_v5, 7  ;;  %s1122_s14 = smov 15   ;;  %s1123_s24 = smov 127   ;;  %v1271_v26 = vand.u32 127, %v113_v5  ;;  %vm436_vm8 = vcmask 1041408  }
  0x71   :  { %s1124_s25 = smov 112   ;;  %s1125_s26 = smov 113   ;;  %v176_v29 = vld [vmem:[#allocation12 + $0x1] ss:$8 sm:$0x3]  ;;  %vm432_vm9 = vcmask 293888  }
  0x72   :  { %v112_v6 = vunpack.c.0.s8 %v111_v4  ;;  %s1126_s27 = smov 111   ;;  %v1273_v27 = vsub.s32 0, %v114_v7  ;;  %v1275_v28 = vsub.s32 1, %v114_v7  ;;  %vm172_vm0 = vcmp.lt.s32.totalorder %v1271_v26, 16  ;;  %s1127_s28 = smov [#allocation14]  }
  0x73   :  { %v239_v34 = vld [vmem:[#allocation12 + $0x3] ss:$8 sm:$0x3]  ;;  %vm235_vm1 = vcmp.lt.s32.totalorder %v1271_v26, 1  ;;  %vm142_vm2 = vcmp.lt.s32.totalorder %v1271_v26, 17  ;;  %vm204_vm3 = vcmp.lt.s32.totalorder %v1271_v26, 15 }
  0x74   :  { %121 = vperm.xlu0 %925, %v102_v2   ;;  %v115_v8 = vsub.s32 %v112_v6, %v114_v7  ;;  %v181_v32 = vrot.slane %v176_v29, %v1273_v27  ;;  %v185_v33 = vrot.slane %v176_v29, %v1275_v28  ;;  %v244_v41 = vrot.slane %v239_v34, %v1273_v27  ;;  %v145_v43 = vld [vmem:[#allocation12] ss:$8 sm:$0x3]  ;;  %v208_v54 = vld [vmem:[#allocation12 + $0x2] ss:$8 sm:$0x3] }
  0x75   :  { %v248_v42 = vrot.slane %v239_v34, %v1275_v28  ;;  %v150_v49 = vrot.slane %v145_v43, %v1273_v27  ;;  %v154_v53 = vrot.slane %v145_v43, %v1275_v28  ;;  %v213_v60 = vrot.slane %v208_v54, %v1273_v27  ;;  %v280_v1 = vld [vmem:[#allocation12 + $0x5] ss:$8 sm:$0x3]  ;;  %s836_s29 = sshll.u32 %s1127_s28, 4  ;;  %s837_s29 = int_to_ptr.vmem [resolvable:$true] %s836_s29 }
  0x76   :  { %v217_v0 = vrot.slane %v208_v54, %v1275_v28  ;;  %vm276_vm4 = vcmp.lt.s32.totalorder %v1271_v26, 127  ;;  %v285_v9 = vrot.slane %v280_v1, %v1273_v27  ;;  %vm339_vm5 = vcmp.lt.s32.totalorder %v1271_v26, 112  ;;  %s1074_s30 = scalar_lea.vmem %s837_s29, 256  ;;  %p1079_p7 = scmp.lt.s32.totalorder %s837_s29, %s837_s29 }
  0x77   :  { %vm308_vm6 = vcmp.lt.s32.totalorder %v1271_v26, 113  ;;  %vm371_vm7 = vcmp.lt.s32.totalorder %v1271_v26, 111  ;;  %v403_v26 = vld [vmem:[#allocation6] sm:$0xff]  ;;  %p1075_p6 = scmp.ne.s32.totalorder %s837_s29, %s1074_s30  ;;  %p1080_p8 = scmp.lt.s32.totalorder %s1074_s30, %s1074_s30 }
  0x79   :  { %p1081_p9 = por %p1080_p8, %p1079_p7 }
  0x7b   :  { %p1082_p10 = pnand %p1081_p9, %p1075_p6 }
  0xef   :  { %v109_v10 = vpop.permute.xlu0 %108 }
  0xf0   :  { %v116_v13 = vrot.slane %v109_v10, %v115_v8  ;;  %v289_v10 = vrot.slane %v280_v1, %v1275_v28 }
  0xf2   :  { %v118_v15 = vmul.f32 %v116_v13, %v105_v11  ;;  %v492_v16 = vmul.f32 %v491_v12, %v116_v13  ;;  %v343_v11 = vld [vmem:[#allocation12 + $0x7] ss:$8 sm:$0x3] }
  0xf3   :  { %v122_v14 = vpop.permute.xlu0 %121 }
  0xf4   :  { %v129_v17 = vrot.slane %v122_v14, %v115_v8 }
  0xf6   :  { %v131_v18 = vadd.f32 %v129_v17, %v118_v15  ;;  %v493_v19 = vadd.f32 %v492_v16, %v129_v17 }
  0xf8   :  { %v132_v20 = vmax.f32 %v131_v18, 0.0  ;;  %v1239_v21 = vmax.f32 %v493_v19, 0.0  ;;  %v348_v19 = vrot.slane %v343_v11, %v1273_v27 }
  0xfa   :  { %231 = vrot.lane.b32.xlu0 %v132_v20, %s1120_s5  ;;  %168 = vrot.lane.b32.xlu1 %v132_v20, %s1117_s17  ;;  %v134_v22 = vcombine.high %v132_v20, %v132_v20  ;;  %v1245_v23 = vcombine.high %v1239_v21, %v1239_v21 }
  0xfc   :  { %v889_v24 = vpack.c.bf16 %v134_v22, %v132_v20  ;;  %v898_v25 = vpack.c.bf16 %v1245_v23, %v1239_v21 }
  0xfe   :  { %136 = vrot.lane.b32.xlu0 %v132_v20, %s1121_s0  ;;  %170 = vrot.lane.b32.xlu1 %v134_v22, %s1117_s17  ;;  %271 = vst [vmem:[#allocation2 + $0x10] sm:$0x33] %v889_v24 }
 0x102   :  { %200 = vrot.lane.b32.xlu0 %v132_v20, %s1122_s14  ;;  %233 = vrot.lane.b32.xlu1 %v134_v22, %s1120_s5 }
 0x106   :  { %272 = vrot.lane.b32.xlu0 %v132_v20, %s1123_s24  ;;  %138 = vrot.lane.b32.xlu1 %v134_v22, %s1121_s0 }
 0x10a   :  { %335 = vrot.lane.b32.xlu0 %v132_v20, %s1124_s25  ;;  %202 = vrot.lane.b32.xlu1 %v134_v22, %s1122_s14 }
 0x10e   :  { %304 = vrot.lane.b32.xlu0 %v132_v20, %s1125_s26  ;;  %274 = vrot.lane.b32.xlu1 %v134_v22, %s1123_s24 }
 0x112   :  { %527 = vrot.lane.b32.xlu0 %v1239_v21, %s1117_s17  ;;  %337 = vrot.lane.b32.xlu1 %v134_v22, %s1124_s25 }
 0x116   :  { %586 = vrot.lane.b32.xlu0 %v1239_v21, %s1120_s5  ;;  %306 = vrot.lane.b32.xlu1 %v134_v22, %s1125_s26 }
 0x11a   :  { %367 = vrot.lane.b32.xlu0 %v132_v20, %s1126_s27  ;;  %529 = vrot.lane.b32.xlu1 %v1245_v23, %s1117_s17  ;;  %v352_v20 = vrot.slane %v343_v11, %v1275_v28 }
 0x11e   :  { %498 = vrot.lane.b32.xlu0 %v1239_v21, %s1121_s0  ;;  %588 = vrot.lane.b32.xlu1 %v1245_v23, %s1120_s5 }
 0x122   :  { %557 = vrot.lane.b32.xlu0 %v1239_v21, %s1122_s14  ;;  %369 = vrot.lane.b32.xlu1 %v134_v22, %s1126_s27  ;;  %v312_v22 = vld [vmem:[#allocation12 + $0x6] ss:$8 sm:$0x3] }
 0x126   :  { %625 = vrot.lane.b32.xlu0 %v1239_v21, %s1123_s24  ;;  %500 = vrot.lane.b32.xlu1 %v1245_v23, %s1121_s0 }
 0x12a   :  { %684 = vrot.lane.b32.xlu0 %v1239_v21, %s1124_s25  ;;  %559 = vrot.lane.b32.xlu1 %v1245_v23, %s1122_s14 }
 0x12e   :  { %655 = vrot.lane.b32.xlu0 %v1239_v21, %s1125_s26  ;;  %627 = vrot.lane.b32.xlu1 %v1245_v23, %s1123_s24 }
 0x132   :  { %714 = vrot.lane.b32.xlu0 %v1239_v21, %s1126_s27  ;;  %686 = vrot.lane.b32.xlu1 %v1245_v23, %s1124_s25 }
 0x136   :  { %657 = vrot.lane.b32.xlu1 %v1245_v23, %s1125_s26 }
 0x13a   :  { %716 = vrot.lane.b32.xlu1 %v1245_v23, %s1126_s27 }
 0x16c   :  { %v232_v30 = vpop.permute.xlu0 %231  ;;  %v169_v31 = vpop.permute.xlu1 %168 }
 0x170   :  { %v137_v35 = vpop.permute.xlu0 %136  ;;  %v171_v36 = vpop.permute.xlu1 %170 }
 0x171   :  { %v173_v37 = vsel %vm172_vm0, %v169_v31, %v171_v36  ;;  %v174_v38 = vsel %vm172_vm0, %v171_v36, %v169_v31 }
 0x172   :  { %v188_v39 = vmul.f32 %v181_v32, %v174_v38  ;;  %v189_v40 = vmul.f32 %v185_v33, %v173_v37  ;;  %v317_v33 = vrot.slane %v312_v22, %v1273_v27  ;;  %v321_v37 = vrot.slane %v312_v22, %v1275_v28  ;;  %v533_v38 = vld [vmem:[#allocation12 + $0x1] ss:$8 sm:$0x3] }
 0x174   :  { %v886_v44 = vpack.c.bf16 %v189_v40, %v188_v39  ;;  %v201_v45 = vpop.permute.xlu0 %200  ;;  %v234_v46 = vpop.permute.xlu1 %233 }
 0x175   :  { %v236_v47 = vsel %vm235_vm1, %v232_v30, %v234_v46  ;;  %v237_v48 = vsel %vm235_vm1, %v234_v46, %v232_v30 }
 0x176   :  { %v197_v50 = vrot.slane %v886_v44, 6  ;;  %v251_v51 = vmul.f32 %v244_v41, %v237_v48  ;;  %v252_v52 = vmul.f32 %v248_v42, %v236_v47  ;;  %v538_v47 = vrot.slane %v533_v38, %v1273_v27 }
 0x177   :  { %v542_v48 = vrot.slane %v533_v38, %v1275_v28 }
 0x178   :  { %199 = vst [vmem:[#allocation2] sm:$0xcc] %v197_v50  ;;  %v888_v55 = vpack.c.bf16 %v252_v52, %v251_v51  ;;  %v273_v56 = vpop.permute.xlu0 %272  ;;  %v139_v57 = vpop.permute.xlu1 %138 }
 0x179   :  { %v143_v58 = vsel %vm142_vm2, %v137_v35, %v139_v57  ;;  %v144_v59 = vsel %vm142_vm2, %v139_v57, %v137_v35 }
 0x17a   :  { %v260_v61 = vrot.slane %v888_v55, 6  ;;  %v157_v62 = vmul.f32 %v150_v49, %v144_v59  ;;  %v158_v63 = vmul.f32 %v154_v53, %v143_v58  ;;  %v592_v53 = vld [vmem:[#allocation12 + $0x3] ss:$8 sm:$0x3] }
 0x17c   :  { %262 = vst [vmem:[#allocation2 + $0x8] sm:$0xcc] %v260_v61  ;;  %v885_v2 = vpack.c.bf16 %v158_v63, %v157_v62  ;;  %v336_v3 = vpop.permute.xlu0 %335  ;;  %v203_v4 = vpop.permute.xlu1 %202  ;;  %v597_v61 = vrot.slane %v592_v53, %v1273_v27  ;;  %v601_v62 = vrot.slane %v592_v53, %v1275_v28  ;;  %v375_v63 = vld [vmem:[#allocation12 + $0x10] ss:$8 sm:$0x3] }
 0x17d   :  { %v205_v5 = vsel %vm204_vm3, %v201_v45, %v203_v4  ;;  %v206_v6 = vsel %vm204_vm3, %v203_v4, %v201_v45 }
 0x17e   :  { %167 = vst [vmem:[#allocation2] sm:$0x33] %v885_v2  ;;  %v220_v7 = vmul.f32 %v213_v60, %v206_v6  ;;  %v221_v8 = vmul.f32 %v217_v0, %v205_v5  ;;  %v380_v5 = vrot.slane %v375_v63, %v1273_v27 }
 0x180   :  { %v887_v12 = vpack.c.bf16 %v221_v8, %v220_v7  ;;  %v305_v13 = vpop.permute.xlu0 %304  ;;  %v275_v14 = vpop.permute.xlu1 %274 }
 0x181   :  { %v277_v15 = vsel %vm276_vm4, %v273_v56, %v275_v14  ;;  %v278_v16 = vsel %vm276_vm4, %v275_v14, %v273_v56 }
 0x182   :  { %230 = vst [vmem:[#allocation2 + $0x8] sm:$0x33] %v887_v12  ;;  %v292_v17 = vmul.f32 %v285_v9, %v277_v15  ;;  %v293_v18 = vmul.f32 %v289_v10, %v278_v16  ;;  %v384_v9 = vrot.slane %v375_v63, %v1275_v28  ;;  %v504_v10 = vld [vmem:[#allocation12] ss:$8 sm:$0x3] }
 0x183   :  { %v509_v16 = vrot.slane %v504_v10, %v1273_v27 }
 0x184   :  { %v890_v24 = vpack.c.bf16 %v293_v18, %v292_v17  ;;  %v528_v29 = vpop.permute.xlu0 %527  ;;  %v338_v30 = vpop.permute.xlu1 %337  ;;  %v513_v17 = vrot.slane %v504_v10, %v1275_v28 }
 0x185   :  { %v340_v31 = vsel %vm339_vm5, %v336_v3, %v338_v30  ;;  %v341_v32 = vsel %vm339_vm5, %v338_v30, %v336_v3  ;;  %v398_v44 = vld [vmem:[#allocation2] sm:$0xff] }
 0x186   :  { %v301_v34 = vrot.slane %v890_v24, 6  ;;  %v355_v35 = vmul.f32 %v348_v19, %v340_v31  ;;  %v356_v36 = vmul.f32 %v352_v20, %v341_v32  ;;  %v563_v31 = vld [vmem:[#allocation12 + $0x2] ss:$8 sm:$0x3] }
 0x187   :  { %v568_v21 = vrot.slane %v563_v31, %v1273_v27  ;;  %v572_v23 = vrot.slane %v563_v31, %v1275_v28 }
 0x188   :  { %303 = vst [vmem:[#allocation2 + $0x10] sm:$0xcc] %v301_v34  ;;  %v892_v39 = vpack.c.bf16 %v356_v36, %v355_v35  ;;  %v587_v40 = vpop.permute.xlu0 %586  ;;  %v307_v41 = vpop.permute.xlu1 %306 }
 0x189   :  { %v309_v42 = vsel %vm308_vm6, %v305_v13, %v307_v41  ;;  %v310_v43 = vsel %vm308_vm6, %v307_v41, %v305_v13  ;;  %v399_v45 = vld [vmem:[#allocation2 + $0x8] sm:$0xff] }
 0x18a   :  { %v926_v46 = vld [vmem:[#allocation2 + $0x4] ss:$8 sps:$4 sm:$0xff]   ;;  %v364_v49 = vrot.slane %v892_v39, 6  ;;  %v324_v50 = vmul.f32 %v317_v33, %v309_v42  ;;  %v325_v51 = vmul.f32 %v321_v37, %v310_v43  ;;  %v860_v52 = vcombine.low %v398_v44, %v399_v45 }
 0x18b   :  { %443 = vmatprep.subr.bf16.mxu0 %v926_v46 }
 0x18c   :  { %366 = vst [vmem:[#allocation2 + $0x18] sm:$0xcc] %v364_v49  ;;  %v891_v54 = vpack.c.bf16 %v325_v51, %v324_v50  ;;  %v368_v55 = vpop.permute.xlu0 %367  ;;  %v530_v56 = vpop.permute.xlu1 %529  ;;  %444 = vmatpush1.bf16.msra.mxu0 %v860_v52 }
 0x18d   :  { %v531_v57 = vsel %vm172_vm0, %v528_v29, %v530_v56  ;;  %v532_v58 = vsel %vm172_vm0, %v530_v56, %v528_v29 }
 0x18e   :  { %334 = vst [vmem:[#allocation2 + $0x18] sm:$0x33] %v891_v54  ;;  %v545_v59 = vmul.f32 %v538_v47, %v532_v58  ;;  %v546_v60 = vmul.f32 %v542_v48, %v531_v57  ;;  %v690_v47 = vld [vmem:[#allocation12 + $0x7] ss:$8 sm:$0x3] }
 0x18f   :  { %v400_v18 = vld [vmem:[#allocation2 + $0x10] sm:$0xff]  ;;  %v695_v53 = vrot.slane %v690_v47, %v1273_v27  ;;  %v699_v54 = vrot.slane %v690_v47, %v1275_v28 }
 0x190   :  { %v895_v0 = vpack.c.bf16 %v546_v60, %v545_v59  ;;  %v499_v1 = vpop.permute.xlu0 %498  ;;  %v589_v2 = vpop.permute.xlu1 %588  ;;  %v661_v60 = vld [vmem:[#allocation12 + $0x6] ss:$8 sm:$0x3] }
 0x191   :  { %v590_v3 = vsel %vm235_vm1, %v587_v40, %v589_v2  ;;  %v591_v4 = vsel %vm235_vm1, %v589_v2, %v587_v40  ;;  %v666_v2 = vrot.slane %v661_v60, %v1273_v27 }
 0x192   :  { %v554_v6 = vrot.slane %v895_v0, 6  ;;  %v604_v7 = vmul.f32 %v597_v61, %v591_v4  ;;  %v605_v8 = vmul.f32 %v601_v62, %v590_v3  ;;  %v103_v3 = vld [vmem:[#allocation11] sm:$0x3] }
 0x194   :  { %556 = vst [vmem:[#allocation2] sm:$0xcc] %v554_v6  ;;  %v897_v11 = vpack.c.bf16 %v605_v8, %v604_v7  ;;  %v558_v12 = vpop.permute.xlu0 %557  ;;  %v370_v13 = vpop.permute.xlu1 %369  ;;  %v670_v8 = vrot.slane %v661_v60, %v1275_v28 }
 0x195   :  { %v372_v14 = vsel %vm371_vm7, %v368_v55, %v370_v13  ;;  %v373_v15 = vsel %vm371_vm7, %v370_v13, %v368_v55  ;;  %v401_v19 = vld [vmem:[#allocation2 + $0x18] sm:$0xff] }
 0x196   :  { %v928_v20 = vld [vmem:[#allocation2 + $0x14] ss:$8 sps:$4 sm:$0xff]   ;;  %v613_v22 = vrot.slane %v897_v11, 6  ;;  %v387_v24 = vmul.f32 %v380_v5, %v372_v14  ;;  %v388_v29 = vmul.f32 %v384_v9, %v373_v15  ;;  %v862_v30 = vcombine.low %v400_v18, %v401_v19  ;;  %v720_v9 = vld [vmem:[#allocation12 + $0x10] ss:$8 sm:$0x3] }
 0x197   :  { %624 = vst [vmem:[#allocation2 + $0x10] sm:$0x33] %v898_v25  ;;  %445 = vmatprep.subr.bf16.mxu0 %v928_v20  ;;  %v631_v25 = vld [vmem:[#allocation12 + $0x5] ss:$8 sm:$0x3]  ;;  %v725_v15 = vrot.slane %v720_v9, %v1273_v27  ;;  %v729_v20 = vrot.slane %v720_v9, %v1275_v28 }
 0x198   :  { %615 = vst [vmem:[#allocation2 + $0x8] sm:$0xcc] %v613_v22  ;;  %v893_v32 = vpack.c.bf16 %v388_v29, %v387_v24  ;;  %v501_v33 = vpop.permute.xlu1 %500  ;;  %446 = vmatpush1.bf16.msra.mxu0 %v862_v30  ;;  %v626_v36 = vpop.permute.xlu0 %625  ;;  %v636_v45 = vrot.slane %v631_v25, %v1273_v27  ;;  %v640_v46 = vrot.slane %v631_v25, %v1275_v28 }
 0x199   :  { %v502_v34 = vsel %vm142_vm2, %v499_v1, %v501_v33  ;;  %v503_v35 = vsel %vm142_vm2, %v501_v33, %v499_v1 }
 0x19a   :  { %397 = vst [vmem:[#allocation2 + $0x20] sm:$0x33] %v893_v32  ;;  %v516_v37 = vmul.f32 %v509_v16, %v503_v35  ;;  %v517_v38 = vmul.f32 %v513_v17, %v502_v34 }
 0x19c   :  { %v894_v39 = vpack.c.bf16 %v517_v38, %v516_v37  ;;  %v560_v40 = vpop.permute.xlu1 %559  ;;  %v685_v48 = vpop.permute.xlu0 %684 }
 0x19d   :  { %v561_v41 = vsel %vm204_vm3, %v558_v12, %v560_v40  ;;  %v562_v42 = vsel %vm204_vm3, %v560_v40, %v558_v12 }
 0x19e   :  { %526 = vst [vmem:[#allocation2] sm:$0x33] %v894_v39  ;;  %v575_v43 = vmul.f32 %v568_v21, %v562_v42  ;;  %v576_v44 = vmul.f32 %v572_v23, %v561_v41  ;;  %v430_v21 = vcombine.high %v403_v26, %v403_v26 }
 0x1a0   :  { %v896_v49 = vpack.c.bf16 %v576_v44, %v575_v43  ;;  %v628_v50 = vpop.permute.xlu1 %627  ;;  %v656_v4 = vpop.permute.xlu0 %655  ;;  %v749_v44 = vld [vmem:[#allocation6 + $0x8] sm:$0xff] }
 0x1a1   :  { %v629_v51 = vsel %vm276_vm4, %v626_v36, %v628_v50  ;;  %v630_v52 = vsel %vm276_vm4, %v628_v50, %v626_v36  ;;  %v402_v55 = vld [vmem:[#allocation2 + $0x20] sm:$0x33] }
 0x1a2   :  { %585 = vst [vmem:[#allocation2 + $0x8] sm:$0x33] %v896_v49  ;;  %v643_v56 = vmul.f32 %v636_v45, %v629_v51  ;;  %v644_v57 = vmul.f32 %v640_v46, %v630_v52  ;;  %v865_v58 = vcombine.high %v402_v55, %v402_v55  ;;  %v864_v59 = vcombine.low %v402_v55, %v402_v55 }
 0x1a3   :  { %v776_v45 = vcombine.high %v749_v44, %v749_v44 }
 0x1a4   :  { %v899_v61 = vpack.c.bf16 %v644_v57, %v643_v56  ;;  %v687_v62 = vpop.permute.xlu1 %686  ;;  %866 = vmatprep.subr.msk.bf16.mxu0 %vm436_vm8, %v865_v58  ;;  %v438_v63 = vsel %vm436_vm8, %v864_v59, 0  ;;  %v715_v22 = vpop.permute.xlu0 %714 }
 0x1a5   :  { %v688_v0 = vsel %vm339_vm5, %v685_v48, %v687_v62  ;;  %v689_v1 = vsel %vm339_vm5, %v687_v62, %v685_v48  ;;  %448 = vmatpush1.bf16.msra.mxu0 %v438_v63 }
 0x1a6   :  { %v652_v5 = vrot.slane %v899_v61, 6  ;;  %v702_v6 = vmul.f32 %v695_v53, %v688_v0  ;;  %v703_v7 = vmul.f32 %v699_v54, %v689_v1 }
 0x1a8   :  { %654 = vst [vmem:[#allocation2 + $0x10] sm:$0xcc] %v652_v5  ;;  %v901_v10 = vpack.c.bf16 %v703_v7, %v702_v6  ;;  %v658_v11 = vpop.permute.xlu1 %657  ;;  %867 = vmatmul.mubr.msk.bf16.vlgmr.msra.gmra.mrb[0].mxu0 %vm432_vm9, %v103_v3 }
 0x1a9   :  { %v659_v12 = vsel %vm308_vm6, %v656_v4, %v658_v11  ;;  %v660_v13 = vsel %vm308_vm6, %v658_v11, %v656_v4  ;;  %v932_v14 = vld [vmem:[#allocation2 + $0x4] ss:$8 sps:$4 sm:$0xff]   ;;  %v934_v16 = vld [vmem:[#allocation2] ss:$8 sps:$4 sm:$0xff]  }
 0x1aa   :  { %v711_v17 = vrot.slane %v901_v10, 6  ;;  %v673_v18 = vmul.f32 %v666_v2, %v659_v12  ;;  %v674_v19 = vmul.f32 %v670_v8, %v660_v13  ;;  %784 = vmatprep.subr.bf16.mxu1 %v932_v14 }
 0x1ab   :  { %785 = vmatpush1.bf16.msra.mxu1 %v934_v16 }
 0x1ac   :  { %713 = vst [vmem:[#allocation2 + $0x18] sm:$0xcc] %v711_v17  ;;  %v900_v24 = vpack.c.bf16 %v674_v19, %v673_v18  ;;  %v717_v29 = vpop.permute.xlu1 %716 }
 0x1ad   :  { %v718_v30 = vsel %vm371_vm7, %v715_v22, %v717_v29  ;;  %v719_v31 = vsel %vm371_vm7, %v717_v29, %v715_v22 }
 0x1ae   :  { %683 = vst [vmem:[#allocation2 + $0x18] sm:$0x33] %v900_v24  ;;  %v732_v27 = vmul.f32 %v725_v15, %v718_v30  ;;  %v733_v32 = vmul.f32 %v729_v20, %v719_v31 }
 0x1b0   :  { %v902_v33 = vpack.c.bf16 %v733_v32, %v732_v27 }
 0x1b2   :  { %742 = vst [vmem:[#allocation2 + $0x20] sm:$0x33] %v902_v33 }
 0x1b5   :  { %v935_v34 = vld [vmem:[#allocation2 + $0x14] ss:$8 sps:$4 sm:$0xff]   ;;  %v937_v35 = vld [vmem:[#allocation2 + $0x10] ss:$8 sps:$4 sm:$0xff]  }
 0x1b6   :  { %786 = vmatprep.subr.bf16.mxu1 %v935_v34 }
 0x1b7   :  { %787 = vmatpush1.bf16.msra.mxu1 %v937_v35 }
 0x1b9   :  { %v747_v28 = vld [vmem:[#allocation2 + $0x20] sm:$0x33] }
 0x1ba   :  { %v882_v36 = vcombine.high %v747_v28, %v747_v28  ;;  %v881_v37 = vcombine.low %v747_v28, %v747_v28 }
 0x1bc   :  { %883 = vmatprep.subr.msk.bf16.mxu1 %vm436_vm8, %v882_v36  ;;  %v779_v38 = vsel %vm436_vm8, %v881_v37, 0 }
 0x1bd   :  { %789 = vmatpush1.bf16.msra.mxu1 %v779_v38 }
 0x1c0   :  { %884 = vmatmul.mubr.msk.bf16.vlgmr.msra.gmra.mrb[0].mxu1 %vm432_vm9, %v103_v3 }
 0x27b   :  { %v477_v23 = vpop.f32.mrb[0].mxu0 }
 0x27c   :  { %v478_v25 = vadd.f32 %v477_v23, %v403_v26  ;;  %v479_v39 = vpop.f32.mrb[1].mxu0 }
 0x27d   :  { %v480_v40 = vadd.f32 %v479_v39, %v430_v21  ;;  %v481_v41 = vpop.f32.mrb[2].mxu0 }
 0x27e   :  { %v482_v42 = vpop.f32.mrb[3].mxu0 }
 0x27f   :  { %v486_v43 = vcombine.low %v478_v25, %v480_v40 }
 0x281   :  { %488 = vst [vmem:[#allocation14] sm:$0xff] %v486_v43 }
 0x293   :  { %v818_v46 = vpop.f32.mrb[0].mxu1 }
 0x294   :  { %v819_v47 = vadd.f32 %v818_v46, %v749_v44  ;;  %v820_v48 = vpop.f32.mrb[1].mxu1 }
 0x295   :  { %v821_v49 = vadd.f32 %v820_v48, %v776_v45  ;;  %v822_v50 = vpop.f32.mrb[2].mxu1 }
 0x296   :  { %v823_v51 = vpop.f32.mrb[3].mxu1 }
 0x297   :  { %v827_v52 = vcombine.low %v819_v47, %v821_v49 }
 0x299   :  { %830 = vst [vmem:[#allocation14 + $0x8] sm:$0xff] %v827_v52 }
 0x29a   :  { %1085 = shalt.err (!%p1082_p10)
}
 0x29b   :  { %s1086_s2 = scalar_lea.hbm %s1411_s6, 256 }
 0x29c   :  { %p1087_p11 = scmp.ne.s32.totalorder %s1411_s6, %s1086_s2  ;;  %p1090_p12 = scmp.lt.u32.totalorder %s1086_s2, %s1411_s6 }
 0x29e   :  { %p1092_p13 = pnand %p1090_p12, %p1087_p11 }
 0x2a0   :  { %1095 = shalt.err (!%p1092_p13)
}
 0x2a1   :  { %842 = dma.vmem_to_hbm [thread:$0]  %s837_s29, 256, %s1411_s6, [#allocation5], %s1107_s7, %s1107_s7, %s1108_s8  }
 0x2a2   :  { %1104 = dma.done.wait [#allocation5], 256  }
 0x2a3   :  { %1105 = vsyncadd [#allocation5], 4294967040 }
 0x2a4   :  { %846 = vsyncpa [#allocation4], 1 }
 0x2a5   :  { %847 = vsyncpa [#allocation7], 1 }
 0x2a6   :  { %848 = vsyncpa [#allocation10], 1 }
 0x2a7   :  { %849 = vsyncpa [#allocation13], 1 }
 0x2a8   :  { %850 = vsyncpa [#allocation5], 1 }

</bundles_post_ra>
